<compile_context>
chip_gen: v7x
topology: tpu7x:2x2x1
jax: 0.10.0
libtpu: 0.0.40
codegen_flags: <defaults>
</compile_context>

<pallas_src>
import functools

import numpy as np
import jax
import jax.numpy as jnp
from jax.experimental import pallas as pl
from jax.experimental.pallas import tpu as pltpu


def _round_up(x, m):
    return (x + m - 1) // m * m


# ----------------------------------------------------------------------------
# Fused kernel: input projection -> BiLSTM recurrence -> hidden2tag -> Viterbi
# ----------------------------------------------------------------------------
def bilstm_crf_kernel(
        # ---- inputs -----------------------------------------------------
        emb_ref,                      # (S, E)
        wih_f, whh_f, b_f,            # (E, 4Hp), (Hp, 4Hp), (1, 4Hp)
        wih_b, whh_b, b_b,            # (E, 4Hp), (Hp, 4Hp), (1, 4Hp)
        h0f, c0f, h0b, c0b,           # (1, Hp) each
        w2t_f, w2t_b, b2t,            # (Hp, Tp), (Hp, Tp), (1, Tp)
        trans_t_ref,                  # (Ts, Tp)  trans_t[j, i] = transitions[i, j]
        trans_stop_ref,               # (1, Tp)   transitions[stop, :] (padded)
        # ---- outputs ----------------------------------------------------
        feats_ref,                    # (S, Tp) f32
        bptr_ref,                     # (S, Tp) int32
        term_ref,                     # (1, Tp) f32
        # ---- scratch ----------------------------------------------------
        gxf_ref, gxb_ref,             # (S, 4Hp)
        hf_all, hb_all,               # (S, Hp)
        *, hidden_pad, start_idx, stop_idx):
    S = emb_ref.shape[0]
    Hp = hidden_pad
    Tp = feats_ref.shape[1]
    Ts = trans_t_ref.shape[0]
    f32 = jnp.float32

    # ---- 1. input projections hoisted out of the recurrence --------------
    emb = emb_ref[...]
    gxf_ref[...] = jnp.dot(emb, wih_f[...], preferred_element_type=f32) + b_f[...]
    gxb_ref[...] = jnp.dot(emb, wih_b[...], preferred_element_type=f32) + b_b[...]

    whh_f_v = whh_f[...]
    whh_b_v = whh_b[...]

    def cell(gx, h, c, whh):
        # PyTorch gate order i, f, g, o -- each gate owns an aligned 128-lane chunk.
        gates = gx + jnp.dot(h, whh, preferred_element_type=f32)       # (1, 4Hp)
        i = jax.nn.sigmoid(gates[:, 0 * Hp:1 * Hp])
        f = jax.nn.sigmoid(gates[:, 1 * Hp:2 * Hp])
        g = jnp.tanh(gates[:, 2 * Hp:3 * Hp])
        o = jax.nn.sigmoid(gates[:, 3 * Hp:4 * Hp])
        c_new = f * c + i * g
        h_new = o * jnp.tanh(c_new)
        return h_new, c_new

    # ---- 2. fused bidirectional recurrence (both directions per iter) ----
    def rnn_body(t, carry):
        hf, cf, hb, cb = carry
        hf, cf = cell(gxf_ref[pl.ds(t, 1), :], hf, cf, whh_f_v)
        hf_all[pl.ds(t, 1), :] = hf
        tb = S - 1 - t
        hb, cb = cell(gxb_ref[pl.ds(tb, 1), :], hb, cb, whh_b_v)
        hb_all[pl.ds(tb, 1), :] = hb
        return (hf, cf, hb, cb)

    jax.lax.fori_loop(0, S, rnn_body,
                      (h0f[...], c0f[...], h0b[...], c0b[...]))

    # ---- 3. hidden2tag: concat(fwd, bwd) @ W.T + b ------------------------
    feats_ref[...] = (
        jnp.dot(hf_all[...], w2t_f[...], preferred_element_type=f32)
        + jnp.dot(hb_all[...], w2t_b[...], preferred_element_type=f32)
        + b2t[...])

    # ---- 4. Viterbi forward pass (in-kernel loop; feats stay in VMEM) ----
    # Constants hoisted out of the time loop (no per-step iota rebuilds).
    lane = jax.lax.broadcasted_iota(jnp.int32, (1, Tp), 1)
    row_t = jax.lax.broadcasted_iota(jnp.int32, (Ts, Tp), 0)
    col_t = jax.lax.broadcasted_iota(jnp.int32, (Ts, Tp), 1)
    eye_t = row_t == col_t
    trans_t = trans_t_ref[...]                       # (Ts, Tp), [from j, to i]

    fv0 = jnp.where(lane == start_idx, 0.0, -10000.0).astype(f32)     # (1, Tp)

    def vit_body(t, fv_row):
        # forward_var row -> column (single hoisted eye-mask reduce)
        fv_col = jnp.sum(jnp.where(eye_t, fv_row, 0.0),
                         axis=1, keepdims=True)                        # (Ts, 1)
        # ntv[j, i] = forward_var[j] + transitions[i, j]
        ntv = fv_col + trans_t                                         # (Ts, Tp)
        vvars = jnp.max(ntv, axis=0, keepdims=True)                    # (1, Tp)
        bptr = jnp.min(jnp.where(ntv == vvars, row_t, Ts),
                       axis=0, keepdims=True)                          # (1, Tp)
        bptr_ref[pl.ds(t, 1), :] = bptr.astype(jnp.int32)
        return vvars + feats_ref[pl.ds(t, 1), :]

    fv_last = jax.lax.fori_loop(0, S, vit_body, fv0)

    term = fv_last + trans_stop_ref[...]
    term = jnp.where((lane == stop_idx) | (lane == start_idx), -10000.0, term)
    term_ref[...] = term


def bilstm_crf_pallas(embeds, qp):
    """One fused pallas_call: returns (feats, backpointers, terminal_var), padded."""
    S = embeds.shape[0]
    Hp = qp["h0f"].shape[1]
    Tp = qp["b2t"].shape[1]
    start_idx = int(qp["start_idx"])
    stop_idx = int(qp["stop_idx"])
    kernel = functools.partial(bilstm_crf_kernel, hidden_pad=Hp,
                               start_idx=start_idx, stop_idx=stop_idx)
    args = [embeds,
            qp["wih_f"], qp["whh_f"], qp["b_f"],
            qp["wih_b"], qp["whh_b"], qp["b_b"],
            qp["h0f"], qp["c0f"], qp["h0b"], qp["c0b"],
            qp["w2t_f"], qp["w2t_b"], qp["b2t"],
            qp["trans_t"], qp["trans_stop"]]
    vmem = pl.BlockSpec(memory_space=pltpu.MemorySpace.VMEM)
    feats, bptr, term = pl.pallas_call(
        kernel,
        out_shape=(jax.ShapeDtypeStruct((S, Tp), jnp.float32),
                   jax.ShapeDtypeStruct((S, Tp), jnp.int32),
                   jax.ShapeDtypeStruct((1, Tp), jnp.float32)),
        in_specs=[vmem] * len(args),
        out_specs=[vmem, vmem, vmem],
        scratch_shapes=[pltpu.VMEM((S, 4 * Hp), jnp.float32),
                        pltpu.VMEM((S, 4 * Hp), jnp.float32),
                        pltpu.VMEM((S, Hp), jnp.float32),
                        pltpu.VMEM((S, Hp), jnp.float32)],
    )(*args)
    return feats, bptr, term


# ----------------------------------------------------------------------------
# Module-equivalent forward
# ----------------------------------------------------------------------------
def bilstm_crf_forward(sentence, params, padded, tag_to_ix):
    T = len(tag_to_ix)
    start_idx = tag_to_ix["<start>"]
    # embedding gather is glue (plain JAX)
    embeds = params["embedding"][sentence]                       # (S, E)
    feats, bptr, term = bilstm_crf_pallas(embeds, padded)        # one fused kernel
    jax.block_until_ready((feats, bptr, term))

    bptr_np = np.asarray(jax.device_get(bptr))[:, :T]            # (S, T)
    term_np = np.asarray(jax.device_get(term))[0, :T]            # (T,)
    feats_np = np.asarray(jax.device_get(feats))[:, :T]          # (S, T)

    # TODO(synk): Viterbi backtracking is a host-side data-dependent pointer
    # chase (the PyTorch reference also drops to numpy here); no Pallas needed.
    best = int(np.argmax(term_np))
    path_score = float(term_np[best])
    best_path = [best]
    for t in range(bptr_np.shape[0] - 1, -1, -1):
        best = int(bptr_np[t, best])
        best_path.append(best)
    start = best_path.pop()
    assert start == start_idx
    best_path.reverse()
    return path_score, best_path, feats_np


# ----------------------------------------------------------------------------
# Deterministic parameter init (logical shapes follow the PyTorch __init__)
# ----------------------------------------------------------------------------
def init_params(key, vocab_size, embedding_dim, hidden_dim, tagset_size,
                start_idx, stop_idx):
    H = hidden_dim // 2
    ks = jax.random.split(key, 16)

    def u(k, shape, scale):
        return jax.random.uniform(k, shape, jnp.float32, -scale, scale)

    k_lstm = 1.0 / np.sqrt(H)
    k_lin = 1.0 / np.sqrt(hidden_dim)
    params = {}
    params["embedding"] = jax.random.normal(
        ks[0], (vocab_size, embedding_dim), jnp.float32)
    # PyTorch LSTM weights are (4H, E)/(4H, H), gate order [i,f,g,o]; kept here
    # pre-transposed for x @ W form; biases combined (b_ih + b_hh).
    params["wih_f"] = u(ks[1], (embedding_dim, 4 * H), k_lstm)
    params["whh_f"] = u(ks[2], (H, 4 * H), k_lstm)
    params["b_f"] = u(ks[3], (1, 4 * H), k_lstm) + u(ks[4], (1, 4 * H), k_lstm)
    params["wih_b"] = u(ks[5], (embedding_dim, 4 * H), k_lstm)
    params["whh_b"] = u(ks[6], (H, 4 * H), k_lstm)
    params["b_b"] = u(ks[7], (1, 4 * H), k_lstm) + u(ks[8], (1, 4 * H), k_lstm)
    # hidden2tag: torch Linear weight (T, 2H); split into fwd/bwd halves, transposed
    w2t = u(ks[9], (tagset_size, hidden_dim), k_lin)
    params["w2t_f"] = jnp.asarray(w2t[:, :H].T)                  # (H, T)
    params["w2t_b"] = jnp.asarray(w2t[:, H:].T)                  # (H, T)
    params["b2t"] = u(ks[10], (1, tagset_size), k_lin)
    # CRF transitions with the same hard constraints as the module
    trans = jax.random.normal(ks[11], (tagset_size, tagset_size), jnp.float32)
    trans = trans.at[start_idx, :].set(-10000.0)
    trans = trans.at[:, stop_idx].set(-10000.0)
    params["transitions"] = trans
    # init_hidden(): randn(2, 1, H); index 0 = fwd dir, 1 = bwd dir
    h0 = jax.random.normal(ks[12], (2, 1, H), jnp.float32)
    c0 = jax.random.normal(ks[13], (2, 1, H), jnp.float32)
    params["h0f"], params["h0b"] = h0[0], h0[1]
    params["c0f"], params["c0b"] = c0[0], c0[1]
    return params


def pad_params(p, *, H, T, start_idx, stop_idx):
    """Build lane-dense, gate-aligned padded parameters for the kernel."""
    Hp = _round_up(H, 128)          # hidden per direction -> full 128-lane chunks
    Tp = _round_up(T, 128)          # tag dim -> 128 lanes (lane-dense stores)
    Ts = _round_up(T, 8)            # "from"-tag dim on sublanes

    def pad2(x, rows, cols, fill=0.0):
        out = jnp.full((rows, cols), fill, jnp.float32)
        return out.at[:x.shape[0], :x.shape[1]].set(x.astype(jnp.float32))

    def pad_gates(w):               # (R, 4H) -> (R, 4Hp), each gate lane-aligned
        out = jnp.zeros((w.shape[0], 4 * Hp), jnp.float32)
        for k in range(4):
            out = out.at[:, k * Hp:k * Hp + H].set(w[:, k * H:(k + 1) * H])
        return out

    q = {"start_idx": start_idx, "stop_idx": stop_idx}
    q["wih_f"] = pad_gates(p["wih_f"])
    q["wih_b"] = pad_gates(p["wih_b"])
    q["whh_f"] = pad2(pad_gates(p["whh_f"]), Hp, 4 * Hp)
    q["whh_b"] = pad2(pad_gates(p["whh_b"]), Hp, 4 * Hp)
    q["b_f"] = pad_gates(p["b_f"])
    q["b_b"] = pad_gates(p["b_b"])
    for k in ("h0f", "c0f", "h0b", "c0b"):
        q[k] = pad2(p[k], 1, Hp)
    q["w2t_f"] = pad2(p["w2t_f"], Hp, Tp)
    q["w2t_b"] = pad2(p["w2t_b"], Hp, Tp)
    q["b2t"] = pad2(p["b2t"], 1, Tp)
    trans = p["transitions"]
    q["trans_t"] = pad2(trans.T, Ts, Tp, fill=-1e9)              # [from j, to i]
    q["trans_stop"] = pad2(trans[stop_idx:stop_idx + 1, :], 1, Tp, fill=-1e9)
    return q


# ----------------------------------------------------------------------------
# Pure NumPy references (validation only)
# ----------------------------------------------------------------------------
def ref_lstm_feats(embeds, p):
    emb = np.asarray(embeds, np.float32)
    H = np.asarray(p["h0f"]).shape[1]

    def sigm(x):
        return 1.0 / (1.0 + np.exp(-x))

    def run(direction, wih, whh, b, h, c):
        wih, whh, b = (np.asarray(a, np.float32) for a in (wih, whh, b))
        h = np.asarray(h, np.float32).copy()
        c = np.asarray(c, np.float32).copy()
        S = emb.shape[0]
        out = np.zeros((S, H), np.float32)
        order = range(S) if direction == "fwd" else range(S - 1, -1, -1)
        for t in order:
            g = emb[t:t + 1] @ wih + h @ whh + b
            i = sigm(g[:, 0 * H:1 * H]); f = sigm(g[:, 1 * H:2 * H])
            gg = np.tanh(g[:, 2 * H:3 * H]); o = sigm(g[:, 3 * H:4 * H])
            c = f * c + i * gg
            h = o * np.tanh(c)
            out[t] = h[0]
        return out

    hf = run("fwd", p["wih_f"], p["whh_f"], p["b_f"], p["h0f"], p["c0f"])
    hb = run("bwd", p["wih_b"], p["whh_b"], p["b_b"], p["h0b"], p["c0b"])
    return (hf @ np.asarray(p["w2t_f"], np.float32)
            + hb @ np.asarray(p["w2t_b"], np.float32)
            + np.asarray(p["b2t"], np.float32))


def np_viterbi(feats, trans, start, stop):
    T = trans.shape[0]
    fv = np.full((T,), -10000.0, np.float32); fv[start] = 0.0
    bps = []
    for t in range(feats.shape[0]):
        ntv = fv[None, :] + trans                      # [to i, from j]
        bp = np.argmax(ntv, axis=1)
        vv = ntv[np.arange(T), bp]
        fv = (vv + feats[t]).astype(np.float32)
        bps.append(bp)
    term = fv + trans[stop]
    term[stop] = -10000.0; term[start] = -10000.0
    best = int(np.argmax(term)); score = float(term[best])
    path = [best]
    for bp in reversed(bps):
        best = int(bp[best]); path.append(best)
    assert path.pop() == start
    path.reverse()
    return score, path


if __name__ == "__main__":
    tag_to_ix = {"O": 0, "B": 1, "I": 2, "<start>": 3, "<stop>": 4}
    vocab_size, embedding_dim, hidden_dim = 50, 16, 32
    seq_len = 8
    T = len(tag_to_ix)
    H = hidden_dim // 2
    start_idx, stop_idx = tag_to_ix["<start>"], tag_to_ix["<stop>"]

    key = jax.random.PRNGKey(0)
    pkey, skey = jax.random.split(key)
    params = init_params(pkey, vocab_size, embedding_dim, hidden_dim, T,
                         start_idx, stop_idx)
    padded = pad_params(params, H=H, T=T, start_idx=start_idx, stop_idx=stop_idx)
    sentence = jax.random.randint(skey, (seq_len,), 0, vocab_size)

    score, tag_seq, feats_np = bilstm_crf_forward(sentence, params, padded,
                                                  tag_to_ix)
    jax.block_until_ready(jnp.float32(score))

    # ---- validation against pure NumPy references ----
    p_host = jax.device_get(params)
    embeds_np = np.asarray(jax.device_get(params["embedding"][sentence]))
    feats_ref = ref_lstm_feats(embeds_np, p_host)
    assert np.allclose(feats_np, feats_ref, atol=3e-2, rtol=3e-2), \
        float(np.max(np.abs(feats_np - feats_ref)))
    ref_score, ref_path = np_viterbi(
        feats_np, np.asarray(p_host["transitions"], np.float32),
        start_idx, stop_idx)
    assert tag_seq == ref_path
    assert abs(score - ref_score) < 1e-3
    assert len(tag_seq) == seq_len
    assert np.isfinite(score)
    assert all(0 <= t < T for t in tag_seq)
    print("KERNEL_OK")
</pallas_src>

<mosaic_0001>
module attributes {stable_mosaic.version = 11 : i64} {
  func.func @bilstm_crf_kernel(%arg0: memref<8x16xf32, #tpu.memory_space<vmem>>, %arg1: memref<16x512xf32, #tpu.memory_space<vmem>>, %arg2: memref<128x512xf32, #tpu.memory_space<vmem>>, %arg3: memref<1x512xf32, #tpu.memory_space<vmem>>, %arg4: memref<16x512xf32, #tpu.memory_space<vmem>>, %arg5: memref<128x512xf32, #tpu.memory_space<vmem>>, %arg6: memref<1x512xf32, #tpu.memory_space<vmem>>, %arg7: memref<1x128xf32, #tpu.memory_space<vmem>>, %arg8: memref<1x128xf32, #tpu.memory_space<vmem>>, %arg9: memref<1x128xf32, #tpu.memory_space<vmem>>, %arg10: memref<1x128xf32, #tpu.memory_space<vmem>>, %arg11: memref<128x128xf32, #tpu.memory_space<vmem>>, %arg12: memref<128x128xf32, #tpu.memory_space<vmem>>, %arg13: memref<1x128xf32, #tpu.memory_space<vmem>>, %arg14: memref<8x128xf32, #tpu.memory_space<vmem>>, %arg15: memref<1x128xf32, #tpu.memory_space<vmem>>, %arg16: memref<8x128xf32, #tpu.memory_space<vmem>>, %arg17: memref<8x128xi32, #tpu.memory_space<vmem>>, %arg18: memref<1x128xf32, #tpu.memory_space<vmem>>, %arg19: memref<8x512xf32, #tpu.memory_space<vmem>>, %arg20: memref<8x512xf32, #tpu.memory_space<vmem>>, %arg21: memref<8x128xf32, #tpu.memory_space<vmem>>, %arg22: memref<8x128xf32, #tpu.memory_space<vmem>>) attributes {dimension_semantics = [], scalar_prefetch = 0 : i64, scratch_operands = 4 : i64, tpu.core_type = #tpu.core_type<tc>} {
    %c0 = arith.constant 0 : index
    %c0_0 = arith.constant 0 : index
    %0 = vector.load %arg0[%c0, %c0_0] : memref<8x16xf32, #tpu.memory_space<vmem>>, vector<8x16xf32>
    %c0_1 = arith.constant 0 : index
    %c0_2 = arith.constant 0 : index
    %1 = vector.load %arg1[%c0_1, %c0_2] : memref<16x512xf32, #tpu.memory_space<vmem>>, vector<16x512xf32>
    %cst = arith.constant dense<0.000000e+00> : vector<8x512xf32>
    %2 = tpu.matmul %0, %1, %cst {dimension_numbers = #tpu.dot_dimension_numbers<[1], [0], [0], [1], [0, 0, 1, 1], [], []>} : vector<8x16xf32>, vector<16x512xf32>, vector<8x512xf32> -> vector<8x512xf32>
    %c0_3 = arith.constant 0 : index
    %c0_4 = arith.constant 0 : index
    %3 = vector.load %arg3[%c0_3, %c0_4] : memref<1x512xf32, #tpu.memory_space<vmem>>, vector<1x512xf32>
    %4 = vector.broadcast %3 : vector<1x512xf32> to vector<8x512xf32>
    %5 = arith.addf %2, %4 : vector<8x512xf32>
    %c0_5 = arith.constant 0 : index
    %c0_6 = arith.constant 0 : index
    %6 = vector.load %arg19[%c0_5, %c0_6] : memref<8x512xf32, #tpu.memory_space<vmem>>, vector<8x512xf32>
    tpu.vector_store %arg19[%c0_5, %c0_6], %5 {strides = array<i32>} : memref<8x512xf32, #tpu.memory_space<vmem>>, vector<8x512xf32>,
    %c0_7 = arith.constant 0 : index
    %c0_8 = arith.constant 0 : index
    %7 = vector.load %arg4[%c0_7, %c0_8] : memref<16x512xf32, #tpu.memory_space<vmem>>, vector<16x512xf32>
    %cst_9 = arith.constant dense<0.000000e+00> : vector<8x512xf32>
    %8 = tpu.matmul %0, %7, %cst_9 {dimension_numbers = #tpu.dot_dimension_numbers<[1], [0], [0], [1], [0, 0, 1, 1], [], []>} : vector<8x16xf32>, vector<16x512xf32>, vector<8x512xf32> -> vector<8x512xf32>
    %c0_10 = arith.constant 0 : index
    %c0_11 = arith.constant 0 : index
    %9 = vector.load %arg6[%c0_10, %c0_11] : memref<1x512xf32, #tpu.memory_space<vmem>>, vector<1x512xf32>
    %10 = vector.broadcast %9 : vector<1x512xf32> to vector<8x512xf32>
    %11 = arith.addf %8, %10 : vector<8x512xf32>
    %c0_12 = arith.constant 0 : index
    %c0_13 = arith.constant 0 : index
    %12 = vector.load %arg20[%c0_12, %c0_13] : memref<8x512xf32, #tpu.memory_space<vmem>>, vector<8x512xf32>
    tpu.vector_store %arg20[%c0_12, %c0_13], %11 {strides = array<i32>} : memref<8x512xf32, #tpu.memory_space<vmem>>, vector<8x512xf32>,
    %c0_14 = arith.constant 0 : index
    %c0_15 = arith.constant 0 : index
    %13 = vector.load %arg2[%c0_14, %c0_15] : memref<128x512xf32, #tpu.memory_space<vmem>>, vector<128x512xf32>
    %c0_16 = arith.constant 0 : index
    %c0_17 = arith.constant 0 : index
    %14 = vector.load %arg5[%c0_16, %c0_17] : memref<128x512xf32, #tpu.memory_space<vmem>>, vector<128x512xf32>
    %c0_18 = arith.constant 0 : index
    %c0_19 = arith.constant 0 : index
    %15 = vector.load %arg7[%c0_18, %c0_19] : memref<1x128xf32, #tpu.memory_space<vmem>>, vector<1x128xf32>
    %c0_20 = arith.constant 0 : index
    %c0_21 = arith.constant 0 : index
    %16 = vector.load %arg8[%c0_20, %c0_21] : memref<1x128xf32, #tpu.memory_space<vmem>>, vector<1x128xf32>
    %c0_22 = arith.constant 0 : index
    %c0_23 = arith.constant 0 : index
    %17 = vector.load %arg9[%c0_22, %c0_23] : memref<1x128xf32, #tpu.memory_space<vmem>>, vector<1x128xf32>
    %c0_24 = arith.constant 0 : index
    %c0_25 = arith.constant 0 : index
    %18 = vector.load %arg10[%c0_24, %c0_25] : memref<1x128xf32, #tpu.memory_space<vmem>>, vector<1x128xf32>
    %c0_i32 = arith.constant 0 : i32
    %c8_i32 = arith.constant 8 : i32
    %19 = arith.addi %c0_i32, %c8_i32 : i32
    %c1_i32 = arith.constant 1 : i32
    %20:4 = scf.for %arg23 = %c0_i32 to %19 step %c1_i32 iter_args(%arg24 = %15, %arg25 = %16, %arg26 = %17, %arg27 = %18) -> (vector<1x128xf32>, vector<1x128xf32>, vector<1x128xf32>, vector<1x128xf32>)  : i32 {
      %54 = arith.index_cast %arg23 : i32 to index
      %c0_55 = arith.constant 0 : index
      %55 = vector.load %arg19[%54, %c0_55] : memref<8x512xf32, #tpu.memory_space<vmem>>, vector<1x512xf32>
      %cst_56 = arith.constant dense<0.000000e+00> : vector<1x512xf32>
      %56 = tpu.matmul %arg24, %13, %cst_56 {dimension_numbers = #tpu.dot_dimension_numbers<[1], [0], [0], [1], [0, 0, 1, 1], [], []>} : vector<1x128xf32>, vector<128x512xf32>, vector<1x512xf32> -> vector<1x512xf32>
      %57 = arith.addf %55, %56 : vector<1x512xf32>
      %58 = vector.extract_strided_slice %57 {offsets = [0, 0], sizes = [1, 128], strides = [1, 1]} : vector<1x512xf32> to vector<1x128xf32>
      %59 = arith.negf %58 : vector<1x128xf32>
      %60 = math.exp %59 : vector<1x128xf32>
      %cst_57 = arith.constant 1.000000e+00 : f32
      %61 = vector.broadcast %cst_57 : f32 to vector<1x128xf32>
      %62 = arith.addf %61, %60 : vector<1x128xf32>
      %63 = arith.divf %61, %62 : vector<1x128xf32>
      %64 = vector.extract_strided_slice %57 {offsets = [0, 128], sizes = [1, 128], strides = [1, 1]} : vector<1x512xf32> to vector<1x128xf32>
      %65 = arith.negf %64 : vector<1x128xf32>
      %66 = math.exp %65 : vector<1x128xf32>
      %cst_58 = arith.constant 1.000000e+00 : f32
      %67 = vector.broadcast %cst_58 : f32 to vector<1x128xf32>
      %68 = arith.addf %67, %66 : vector<1x128xf32>
      %69 = arith.divf %67, %68 : vector<1x128xf32>
      %70 = vector.extract_strided_slice %57 {offsets = [0, 256], sizes = [1, 128], strides = [1, 1]} : vector<1x512xf32> to vector<1x128xf32>
      %71 = math.tanh %70 : vector<1x128xf32>
      %72 = vector.extract_strided_slice %57 {offsets = [0, 384], sizes = [1, 128], strides = [1, 1]} : vector<1x512xf32> to vector<1x128xf32>
      %73 = arith.negf %72 : vector<1x128xf32>
      %74 = math.exp %73 : vector<1x128xf32>
      %cst_59 = arith.constant 1.000000e+00 : f32
      %75 = vector.broadcast %cst_59 : f32 to vector<1x128xf32>
      %76 = arith.addf %75, %74 : vector<1x128xf32>
      %77 = arith.divf %75, %76 : vector<1x128xf32>
      %78 = arith.mulf %69, %arg25 : vector<1x128xf32>
      %79 = arith.mulf %63, %71 : vector<1x128xf32>
      %80 = arith.addf %78, %79 : vector<1x128xf32>
      %81 = math.tanh %80 : vector<1x128xf32>
      %82 = arith.mulf %77, %81 : vector<1x128xf32>
      %83 = arith.index_cast %arg23 : i32 to index
      %c0_60 = arith.constant 0 : index
      %84 = vector.load %arg21[%83, %c0_60] : memref<8x128xf32, #tpu.memory_space<vmem>>, vector<1x128xf32>
      tpu.vector_store %arg21[%83, %c0_60], %82 {strides = array<i32>} : memref<8x128xf32, #tpu.memory_space<vmem>>, vector<1x128xf32>,
      %c7_i32 = arith.constant 7 : i32
      %85 = arith.subi %c7_i32, %arg23 : i32
      %86 = arith.index_cast %85 : i32 to index
      %c0_61 = arith.constant 0 : index
      %87 = vector.load %arg20[%86, %c0_61] : memref<8x512xf32, #tpu.memory_space<vmem>>, vector<1x512xf32>
      %cst_62 = arith.constant dense<0.000000e+00> : vector<1x512xf32>
      %88 = tpu.matmul %arg26, %14, %cst_62 {dimension_numbers = #tpu.dot_dimension_numbers<[1], [0], [0], [1], [0, 0, 1, 1], [], []>} : vector<1x128xf32>, vector<128x512xf32>, vector<1x512xf32> -> vector<1x512xf32>
      %89 = arith.addf %87, %88 : vector<1x512xf32>
      %90 = vector.extract_strided_slice %89 {offsets = [0, 0], sizes = [1, 128], strides = [1, 1]} : vector<1x512xf32> to vector<1x128xf32>
      %91 = arith.negf %90 : vector<1x128xf32>
      %92 = math.exp %91 : vector<1x128xf32>
      %cst_63 = arith.constant 1.000000e+00 : f32
      %93 = vector.broadcast %cst_63 : f32 to vector<1x128xf32>
      %94 = arith.addf %93, %92 : vector<1x128xf32>
      %95 = arith.divf %93, %94 : vector<1x128xf32>
      %96 = vector.extract_strided_slice %89 {offsets = [0, 128], sizes = [1, 128], strides = [1, 1]} : vector<1x512xf32> to vector<1x128xf32>
      %97 = arith.negf %96 : vector<1x128xf32>
      %98 = math.exp %97 : vector<1x128xf32>
      %cst_64 = arith.constant 1.000000e+00 : f32
      %99 = vector.broadcast %cst_64 : f32 to vector<1x128xf32>
      %100 = arith.addf %99, %98 : vector<1x128xf32>
      %101 = arith.divf %99, %100 : vector<1x128xf32>
      %102 = vector.extract_strided_slice %89 {offsets = [0, 256], sizes = [1, 128], strides = [1, 1]} : vector<1x512xf32> to vector<1x128xf32>
      %103 = math.tanh %102 : vector<1x128xf32>
      %104 = vector.extract_strided_slice %89 {offsets = [0, 384], sizes = [1, 128], strides = [1, 1]} : vector<1x512xf32> to vector<1x128xf32>
      %105 = arith.negf %104 : vector<1x128xf32>
      %106 = math.exp %105 : vector<1x128xf32>
      %cst_65 = arith.constant 1.000000e+00 : f32
      %107 = vector.broadcast %cst_65 : f32 to vector<1x128xf32>
      %108 = arith.addf %107, %106 : vector<1x128xf32>
      %109 = arith.divf %107, %108 : vector<1x128xf32>
      %110 = arith.mulf %101, %arg27 : vector<1x128xf32>
      %111 = arith.mulf %95, %103 : vector<1x128xf32>
      %112 = arith.addf %110, %111 : vector<1x128xf32>
      %113 = math.tanh %112 : vector<1x128xf32>
      %114 = arith.mulf %109, %113 : vector<1x128xf32>
      %115 = arith.index_cast %85 : i32 to index
      %c0_66 = arith.constant 0 : index
      %116 = vector.load %arg22[%115, %c0_66] : memref<8x128xf32, #tpu.memory_space<vmem>>, vector<1x128xf32>
      tpu.vector_store %arg22[%115, %c0_66], %114 {strides = array<i32>} : memref<8x128xf32, #tpu.memory_space<vmem>>, vector<1x128xf32>,
      scf.yield %82, %80, %114, %112 : vector<1x128xf32>, vector<1x128xf32>, vector<1x128xf32>, vector<1x128xf32>
    }
    %c8_i32_26 = arith.constant 8 : i32
    %c0_27 = arith.constant 0 : index
    %c0_28 = arith.constant 0 : index
    %21 = vector.load %arg21[%c0_27, %c0_28] : memref<8x128xf32, #tpu.memory_space<vmem>>, vector<8x128xf32>
    %c0_29 = arith.constant 0 : index
    %c0_30 = arith.constant 0 : index
    %22 = vector.load %arg11[%c0_29, %c0_30] : memref<128x128xf32, #tpu.memory_space<vmem>>, vector<128x128xf32>
    %cst_31 = arith.constant dense<0.000000e+00> : vector<8x128xf32>
    %23 = tpu.matmul %21, %22, %cst_31 {dimension_numbers = #tpu.dot_dimension_numbers<[1], [0], [0], [1], [0, 0, 1, 1], [], []>} : vector<8x128xf32>, vector<128x128xf32>, vector<8x128xf32> -> vector<8x128xf32>
    %c0_32 = arith.constant 0 : index
    %c0_33 = arith.constant 0 : index
    %24 = vector.load %arg22[%c0_32, %c0_33] : memref<8x128xf32, #tpu.memory_space<vmem>>, vector<8x128xf32>
    %c0_34 = arith.constant 0 : index
    %c0_35 = arith.constant 0 : index
    %25 = vector.load %arg12[%c0_34, %c0_35] : memref<128x128xf32, #tpu.memory_space<vmem>>, vector<128x128xf32>
    %cst_36 = arith.constant dense<0.000000e+00> : vector<8x128xf32>
    %26 = tpu.matmul %24, %25, %cst_36 {dimension_numbers = #tpu.dot_dimension_numbers<[1], [0], [0], [1], [0, 0, 1, 1], [], []>} : vector<8x128xf32>, vector<128x128xf32>, vector<8x128xf32> -> vector<8x128xf32>
    %27 = arith.addf %23, %26 : vector<8x128xf32>
    %c0_37 = arith.constant 0 : index
    %c0_38 = arith.constant 0 : index
    %28 = vector.load %arg13[%c0_37, %c0_38] : memref<1x128xf32, #tpu.memory_space<vmem>>, vector<1x128xf32>
    %29 = vector.broadcast %28 : vector<1x128xf32> to vector<8x128xf32>
    %30 = arith.addf %27, %29 : vector<8x128xf32>
    %c0_39 = arith.constant 0 : index
    %c0_40 = arith.constant 0 : index
    %31 = vector.load %arg16[%c0_39, %c0_40] : memref<8x128xf32, #tpu.memory_space<vmem>>, vector<8x128xf32>
    tpu.vector_store %arg16[%c0_39, %c0_40], %30 {strides = array<i32>} : memref<8x128xf32, #tpu.memory_space<vmem>>, vector<8x128xf32>,
    %32 = tpu.iota {dimensions = array<i32: 1>} : vector<1x128xi32>
    %33 = tpu.iota {dimensions = array<i32: 0>} : vector<8x128xi32>
    %34 = tpu.iota {dimensions = array<i32: 1>} : vector<8x128xi32>
    %35 = arith.cmpi eq, %33, %34 : vector<8x128xi32>
    %c0_41 = arith.constant 0 : index
    %c0_42 = arith.constant 0 : index
    %36 = vector.load %arg14[%c0_41, %c0_42] : memref<8x128xf32, #tpu.memory_space<vmem>>, vector<8x128xf32>
    %c3_i32 = arith.constant 3 : i32
    %37 = vector.broadcast %c3_i32 : i32 to vector<1x128xi32>
    %38 = arith.cmpi eq, %32, %37 : vector<1x128xi32>
    %cst_43 = arith.constant 0.000000e+00 : f32
    %cst_44 = arith.constant -1.000000e+04 : f32
    %39 = vector.broadcast %cst_43 : f32 to vector<1x128xf32>
    %40 = vector.broadcast %cst_44 : f32 to vector<1x128xf32>
    %41 = arith.select %38, %39, %40 : vector<1x128xi1>, vector<1x128xf32>
    %c0_i32_45 = arith.constant 0 : i32
    %c8_i32_46 = arith.constant 8 : i32
    %42 = arith.addi %c0_i32_45, %c8_i32_46 : i32
    %c1_i32_47 = arith.constant 1 : i32
    %43 = scf.for %arg23 = %c0_i32_45 to %42 step %c1_i32_47 iter_args(%arg24 = %41) -> (vector<1x128xf32>)  : i32 {
      %cst_55 = arith.constant 0.000000e+00 : f32
      %54 = vector.shape_cast %arg24 : vector<1x128xf32> to vector<1x128xf32>
      %55 = vector.broadcast %54 : vector<1x128xf32> to vector<8x128xf32>
      %56 = vector.broadcast %cst_55 : f32 to vector<8x128xf32>
      %57 = arith.select %35, %55, %56 : vector<8x128xi1>, vector<8x128xf32>
      %cst_56 = arith.constant dense<0.000000e+00> : vector<8xf32>
      %58 = vector.multi_reduction <add>, %57, %cst_56 [1] : vector<8x128xf32> to vector<8xf32>
      %59 = vector.shape_cast %58 : vector<8xf32> to vector<8x1xf32>
      %60 = vector.broadcast %59 : vector<8x1xf32> to vector<8x128xf32>
      %61 = arith.addf %60, %36 : vector<8x128xf32>
      %cst_57 = arith.constant dense<0xFF800000> : vector<128xf32>
      %62 = vector.multi_reduction <maximumf>, %61, %cst_57 [0] : vector<8x128xf32> to vector<128xf32>
      %63 = vector.shape_cast %62 : vector<128xf32> to vector<1x128xf32>
      %64 = vector.broadcast %63 : vector<1x128xf32> to vector<8x128xf32>
      %65 = arith.cmpf oeq, %61, %64 : vector<8x128xf32>
      %c8_i32_58 = arith.constant 8 : i32
      %66 = vector.broadcast %c8_i32_58 : i32 to vector<8x128xi32>
      %67 = arith.select %65, %33, %66 : vector<8x128xi1>, vector<8x128xi32>
      %cst_59 = arith.constant dense<2147483647> : vector<128xi32>
      %68 = vector.multi_reduction <minsi>, %67, %cst_59 [0] : vector<8x128xi32> to vector<128xi32>
      %69 = vector.shape_cast %68 : vector<128xi32> to vector<1x128xi32>
      %70 = arith.index_cast %arg23 : i32 to index
      %c0_60 = arith.constant 0 : index
      %71 = vector.load %arg17[%70, %c0_60] : memref<8x128xi32, #tpu.memory_space<vmem>>, vector<1x128xi32>
      tpu.vector_store %arg17[%70, %c0_60], %69 {strides = array<i32>} : memref<8x128xi32, #tpu.memory_space<vmem>>, vector<1x128xi32>,
      %72 = arith.index_cast %arg23 : i32 to index
      %c0_61 = arith.constant 0 : index
      %73 = vector.load %arg16[%72, %c0_61] : memref<8x128xf32, #tpu.memory_space<vmem>>, vector<1x128xf32>
      %74 = arith.addf %63, %73 : vector<1x128xf32>
      scf.yield %74 : vector<1x128xf32>
    }
    %c8_i32_48 = arith.constant 8 : i32
    %c0_49 = arith.constant 0 : index
    %c0_50 = arith.constant 0 : index
    %44 = vector.load %arg15[%c0_49, %c0_50] : memref<1x128xf32, #tpu.memory_space<vmem>>, vector<1x128xf32>
    %45 = arith.addf %43, %44 : vector<1x128xf32>
    %c4_i32 = arith.constant 4 : i32
    %46 = vector.broadcast %c4_i32 : i32 to vector<1x128xi32>
    %47 = arith.cmpi eq, %32, %46 : vector<1x128xi32>
    %c3_i32_51 = arith.constant 3 : i32
    %48 = vector.broadcast %c3_i32_51 : i32 to vector<1x128xi32>
    %49 = arith.cmpi eq, %32, %48 : vector<1x128xi32>
    %50 = arith.ori %47, %49 : vector<1x128xi1>
    %cst_52 = arith.constant -1.000000e+04 : f32
    %51 = vector.broadcast %cst_52 : f32 to vector<1x128xf32>
    %52 = arith.select %50, %51, %45 : vector<1x128xi1>, vector<1x128xf32>
    %c0_53 = arith.constant 0 : index
    %c0_54 = arith.constant 0 : index
    %53 = vector.load %arg18[%c0_53, %c0_54] : memref<1x128xf32, #tpu.memory_space<vmem>>, vector<1x128xf32>
    tpu.vector_store %arg18[%c0_53, %c0_54], %52 {strides = array<i32>} : memref<1x128xf32, #tpu.memory_space<vmem>>, vector<1x128xf32>,
    return
  }
}

</mosaic_0001>

<bundles_post_ra>
// kernel: tpu_custom_call.1
= control target key start
LH: loop header
LB: loop body
LE: loop exit
PB: predicated region body
PF: predicated region fallthrough
CT: control target
= control target key end

     0   :  { %s2895_s0 = inlined_call_operand.hbm [shape: f32[8,16], index: 0, kind: input, shape index: {}]   ;;  %s2896_s1 = inlined_call_operand.hbm [shape: f32[16,512], index: 1, kind: input, shape index: {}]   ;;  %s2897_s2 = inlined_call_operand.hbm [shape: f32[128,512], index: 2, kind: input, shape index: {}]   ;;  %s2898_s3 = inlined_call_operand.vmem [shape: f32[1,512], index: 3, kind: input, shape index: {}]   ;;  %s2899_s4 = inlined_call_operand.hbm [shape: f32[16,512], index: 4, kind: input, shape index: {}]   ;;  %s2900_s5 = inlined_call_operand.hbm [shape: f32[128,512], index: 5, kind: input, shape index: {}]   ;;  %s2901_s6 = inlined_call_operand.vmem [shape: f32[1,512], index: 6, kind: input, shape index: {}]   ;;  %s2902_s7 = inlined_call_operand.vmem [shape: f32[1,128], index: 7, kind: input, shape index: {}]   ;;  %s2903_s8 = inlined_call_operand.vmem [shape: f32[1,128], index: 8, kind: input, shape index: {}]   ;;  %s2904_s9 = inlined_call_operand.vmem [shape: f32[1,128], index: 9, kind: input, shape index: {}]   ;;  %s2905_s10 = inlined_call_operand.vmem [shape: f32[1,128], index: 10, kind: input, shape index: {}]   ;;  %s2906_s11 = inlined_call_operand.hbm [shape: f32[128,128], index: 11, kind: input, shape index: {}]   ;;  %s2907_s12 = inlined_call_operand.hbm [shape: f32[128,128], index: 12, kind: input, shape index: {}]   ;;  %s2908_s13 = inlined_call_operand.vmem [shape: f32[1,128], index: 13, kind: input, shape index: {}]   ;;  %s2909_s14 = inlined_call_operand.vmem [shape: f32[8,128], index: 14, kind: input, shape index: {}]   ;;  %s2910_s15 = inlined_call_operand.vmem [shape: f32[1,128], index: 15, kind: input, shape index: {}]   ;;  %s2911_s16 = inlined_call_operand.hbm [shape: f32[8,128], index: 16, kind: output, shape index: {0}]   ;;  %s2912_s17 = inlined_call_operand.hbm [shape: s32[8,128], index: 17, kind: output, shape index: {1}]   ;;  %s2913_s18 = inlined_call_operand.hbm [shape: f32[1,128], index: 18, kind: output, shape index: {2}]  }
   0x1   :  { %2928 = sst [smem:[#allocation124_spill]] %s2895_s0 }
   0x2   :  { %2929 = sst [smem:[#allocation125_spill]] %s2896_s1 }
   0x3   :  { %2930 = sst [smem:[#allocation126_spill]] %s2897_s2 }
   0x4   :  { %2931 = sst [smem:[#allocation127_spill]] %s2911_s16 }
   0x5   :  { %2932 = sst [smem:[#allocation128_spill]] %s2913_s18 }
   0x6   :  { %24 = vsyncpa [#allocation7], 0 }
   0x7   :  { %25 = vsyncpa [#allocation10], 0 }
   0x8   :  { %26 = vsyncpa [#allocation13], 0 }
   0x9   :  { %27 = vsyncpa [#allocation16], 0 }
   0xa   :  { %28 = vsyncpa [#allocation8], 0 }
   0xb   :  { %29 = vsyncpa [#allocation20], 0  ;;  %s2102_s27 = smov [#allocation9]   ;;  %s2933_s0 = sld [smem:[#allocation125_spill]] }
   0xc   :  { %s45_s28 = sshll.u32 %s2102_s27, 4  ;;  %s46_s28 = int_to_ptr.vmem [resolvable:$true] %s45_s28 }
  0x11   :  { %s1814_s19 = scalar_lea.hbm %s2933_s0, 1024 }
  0x12   :  { %p1815_p0 = scmp.ne.s32.totalorder %s2933_s0, %s1814_s19  ;;  %p1818_p1 = scmp.lt.u32.totalorder %s1814_s19, %s2933_s0 }
  0x14   :  { %p1820_p2 = pnand %p1818_p1, %p1815_p0 }
  0x16   :  { %1823 = shalt.err (!%p1820_p2)
}
  0x17   :  { %s1824_s2 = scalar_lea.vmem %s46_s28, 1024  ;;  %p1829_p4 = scmp.lt.s32.totalorder %s46_s28, %s46_s28 }
  0x18   :  { %p1825_p3 = scmp.ne.s32.totalorder %s46_s28, %s1824_s2  ;;  %p1830_p5 = scmp.lt.s32.totalorder %s1824_s2, %s1824_s2 }
  0x1a   :  { %p1831_p6 = por %p1830_p5, %p1829_p4 }
  0x1c   :  { %p1832_p7 = pnand %p1831_p6, %p1825_p3 }
  0x1e   :  { %1835 = shalt.err (!%p1832_p7)
}
  0x1f   :  { %s2919_s23 = smov 512   ;;  %s2104_s24 = smov 32  }
  0x20   :  { %51 = dma.hbm_to_vmem [thread:$0]  %s2933_s0, 1024, %s46_s28, [#allocation10], %s2919_s23, %s2919_s23, %s2104_s24  }
  0x21   :  { %s2105_s27 = smov [#allocation12]   ;;  %s2106_s30 = smov [#allocation15]  }
  0x22   :  { %s71_s29 = sshll.u32 %s2105_s27, 4  ;;  %s105_s19 = sshll.u32 %s2106_s30, 4  ;;  %s72_s29 = int_to_ptr.vmem [resolvable:$true] %s71_s29  ;;  %s106_s19 = int_to_ptr.vmem [resolvable:$true] %s105_s19 }
  0x23   :  { %s1836_s21 = scalar_lea.hbm %s2899_s4, 1024 }
  0x24   :  { %p1837_p8 = scmp.ne.s32.totalorder %s2899_s4, %s1836_s21  ;;  %p1840_p9 = scmp.lt.u32.totalorder %s1836_s21, %s2899_s4 }
  0x26   :  { %p1842_p10 = pnand %p1840_p9, %p1837_p8 }
  0x28   :  { %1845 = shalt.err (!%p1842_p10)
}
  0x29   :  { %s1846_s28 = scalar_lea.vmem %s72_s29, 1024  ;;  %p1851_p12 = scmp.lt.s32.totalorder %s72_s29, %s72_s29 }
  0x2a   :  { %p1847_p11 = scmp.ne.s32.totalorder %s72_s29, %s1846_s28  ;;  %p1852_p13 = scmp.lt.s32.totalorder %s1846_s28, %s1846_s28 }
  0x2c   :  { %p1853_p0 = por %p1852_p13, %p1851_p12 }
  0x2e   :  { %p1854_p1 = pnand %p1853_p0, %p1847_p11 }
  0x30   :  { %1857 = shalt.err (!%p1854_p1)
}
  0x31   :  { %77 = dma.hbm_to_vmem [thread:$0]  %s2899_s4, 1024, %s72_s29, [#allocation13], %s2919_s23, %s2919_s23, %s2104_s24  }
  0x32   :  { %s1858_s18 = scalar_lea.hbm %s2906_s11, 2048 }
  0x33   :  { %p1859_p2 = scmp.ne.s32.totalorder %s2906_s11, %s1858_s18  ;;  %p1862_p3 = scmp.lt.u32.totalorder %s1858_s18, %s2906_s11 }
  0x35   :  { %p1864_p4 = pnand %p1862_p3, %p1859_p2 }
  0x37   :  { %1867 = shalt.err (!%p1864_p4)
}
  0x38   :  { %s1868_s21 = scalar_lea.vmem %s106_s19, 2048  ;;  %p1873_p6 = scmp.lt.s32.totalorder %s106_s19, %s106_s19 }
  0x39   :  { %p1869_p5 = scmp.ne.s32.totalorder %s106_s19, %s1868_s21  ;;  %p1874_p7 = scmp.lt.s32.totalorder %s1868_s21, %s1868_s21 }
  0x3b   :  { %p1875_p8 = por %p1874_p7, %p1873_p6 }
  0x3d   :  { %p1876_p9 = pnand %p1875_p8, %p1869_p5 }
  0x3f   :  { %1879 = shalt.err (!%p1876_p9)
}
  0x40   :  { %s2107_s4 = smov 128   ;;  %s2108_s29 = smov 8  }
  0x41   :  { %111 = dma.hbm_to_vmem [thread:$0]  %s2906_s11, 2048, %s106_s19, [#allocation16], %s2107_s4, %s2107_s4, %s2108_s29  }
  0x42   :  { %s2109_s28 = smov [#allocation6]   ;;  %s2110_s25 = smov [#allocation11]  }
  0x43   :  { %s36_s0 = sshll.u32 %s2109_s28, 4  ;;  %s57_s26 = sshll.u32 %s2110_s25, 4  ;;  %s37_s0 = int_to_ptr.vmem [resolvable:$true] %s36_s0  ;;  %s58_s26 = int_to_ptr.vmem [resolvable:$true] %s57_s26 }
  0x44   :  { %s2934_s27 = sld [smem:[#allocation124_spill]] }
  0x4a   :  { %s1880_s30 = scalar_lea.hbm %s2934_s27, 128 }
  0x4b   :  { %p1881_p10 = scmp.ne.s32.totalorder %s2934_s27, %s1880_s30  ;;  %p1884_p11 = scmp.lt.u32.totalorder %s1880_s30, %s2934_s27 }
  0x4d   :  { %p1886_p12 = pnand %p1884_p11, %p1881_p10 }
  0x4f   :  { %1889 = shalt.err (!%p1886_p12)
}
  0x50   :  { %s1890_s11 = scalar_lea.vmem %s37_s0, 128  ;;  %p1895_p0 = scmp.lt.s32.totalorder %s37_s0, %s37_s0 }
  0x51   :  { %p1891_p13 = scmp.ne.s32.totalorder %s37_s0, %s1890_s11  ;;  %p1896_p1 = scmp.lt.s32.totalorder %s1890_s11, %s1890_s11 }
  0x53   :  { %p1897_p2 = por %p1896_p1, %p1895_p0 }
  0x55   :  { %p1898_p3 = pnand %p1897_p2, %p1891_p13 }
  0x57   :  { %1901 = shalt.err (!%p1898_p3)
}
  0x58   :  { %39 = dma.hbm_to_vmem [thread:$0]  %s2934_s27, 128, %s37_s0, [#allocation7]  }
  0x59   :  { %s2935_s25 = sld [smem:[#allocation126_spill]] }
  0x5f   :  { %s1902_s16 = scalar_lea.hbm %s2935_s25, 8192 }
  0x60   :  { %p1903_p4 = scmp.ne.s32.totalorder %s2935_s25, %s1902_s16  ;;  %p1906_p5 = scmp.lt.u32.totalorder %s1902_s16, %s2935_s25 }
  0x62   :  { %p1908_p6 = pnand %p1906_p5, %p1903_p4 }
  0x64   :  { %1911 = shalt.err (!%p1908_p6)
}
  0x65   :  { %s1912_s20 = scalar_lea.vmem %s58_s26, 8192  ;;  %p1917_p8 = scmp.lt.s32.totalorder %s58_s26, %s58_s26 }
  0x66   :  { %p1913_p7 = scmp.ne.s32.totalorder %s58_s26, %s1912_s20  ;;  %p1918_p9 = scmp.lt.s32.totalorder %s1912_s20, %s1912_s20 }
  0x68   :  { %p1919_p10 = por %p1918_p9, %p1917_p8 }
  0x6a   :  { %p1920_p11 = pnand %p1919_p10, %p1913_p7 }
  0x6c   :  { %1923 = shalt.err (!%p1920_p11)
}
  0x6d   :  { %s2936_s0 = smov 512   ;;  %s2111_s11 = smov [#allocation14]  }
  0x6e   :  { %63 = dma.hbm_to_vmem [thread:$0]  %s2935_s25, 8192, %s58_s26, [#allocation10], %s2936_s0, %s2936_s0, %s2104_s24  }
  0x6f   :  { %s83_s19 = sshll.u32 %s2111_s11, 4  ;;  %s2112_s22 = smov [#allocation17]   ;;  %s84_s19 = int_to_ptr.vmem [resolvable:$true] %s83_s19 }
  0x70   :  { %s117_s2 = sshll.u32 %s2112_s22, 4  ;;  %s1924_s23 = scalar_lea.hbm %s2900_s5, 8192  ;;  %s118_s2 = int_to_ptr.vmem [resolvable:$true] %s117_s2 }
  0x71   :  { %p1925_p12 = scmp.ne.s32.totalorder %s2900_s5, %s1924_s23  ;;  %p1928_p13 = scmp.lt.u32.totalorder %s1924_s23, %s2900_s5 }
  0x73   :  { %p1930_p0 = pnand %p1928_p13, %p1925_p12 }
  0x75   :  { %1933 = shalt.err (!%p1930_p0)
}
  0x76   :  { %s1934_s26 = scalar_lea.vmem %s84_s19, 8192  ;;  %p1939_p2 = scmp.lt.s32.totalorder %s84_s19, %s84_s19 }
  0x77   :  { %p1935_p1 = scmp.ne.s32.totalorder %s84_s19, %s1934_s26  ;;  %p1940_p3 = scmp.lt.s32.totalorder %s1934_s26, %s1934_s26 }
  0x79   :  { %p1941_p4 = por %p1940_p3, %p1939_p2 }
  0x7b   :  { %p1942_p5 = pnand %p1941_p4, %p1935_p1 }
  0x7d   :  { %1945 = shalt.err (!%p1942_p5)
}
  0x7e   :  { %89 = dma.hbm_to_vmem [thread:$0]  %s2900_s5, 8192, %s84_s19, [#allocation13], %s2936_s0, %s2936_s0, %s2104_s24  }
  0x7f   :  { %s1946_s22 = scalar_lea.hbm %s2907_s12, 2048 }
  0x80   :  { %p1947_p6 = scmp.ne.s32.totalorder %s2907_s12, %s1946_s22  ;;  %p1950_p7 = scmp.lt.u32.totalorder %s1946_s22, %s2907_s12 }
  0x82   :  { %p1952_p8 = pnand %p1950_p7, %p1947_p6 }
  0x84   :  { %1955 = shalt.err (!%p1952_p8)
}
  0x85   :  { %s1956_s30 = scalar_lea.vmem %s118_s2, 2048  ;;  %p1961_p10 = scmp.lt.s32.totalorder %s118_s2, %s118_s2 }
  0x86   :  { %p1957_p9 = scmp.ne.s32.totalorder %s118_s2, %s1956_s30  ;;  %p1962_p11 = scmp.lt.s32.totalorder %s1956_s30, %s1956_s30 }
  0x88   :  { %p1963_p12 = por %p1962_p11, %p1961_p10 }
  0x8a   :  { %p1964_p13 = pnand %p1963_p12, %p1957_p9 }
  0x8c   :  { %1967 = shalt.err (!%p1964_p13)
}
  0x8d   :  { %123 = dma.hbm_to_vmem [thread:$0]  %s2907_s12, 2048, %s118_s2, [#allocation16], %s2107_s4, %s2107_s4, %s2108_s29  }
  0x8e   :  { %2062 = dma.done.wait [#allocation7], 128  }
  0x8f   :  { %2063 = vsyncadd [#allocation7], 4294967168 }
  0x90   :  { %2064 = dma.done.wait [#allocation10], 9216  }
  0x91   :  { %2065 = vsyncadd [#allocation10], 4294958080 }
  0x92   :  { %2066 = dma.done.wait [#allocation13], 9216  }
  0x93   :  { %2067 = vsyncadd [#allocation13], 4294958080 }
  0x94   :  { %2068 = dma.done.wait [#allocation16], 4096  }
  0x95   :  { %2069 = vsyncadd [#allocation16], 4294963200  ;;  %v2921_v0 = vmov 0.0   ;;  %v2321_v1 = vld [vmem:[#allocation11] sm:$0xff]  ;;  %v2323_v2 = vld [vmem:[#allocation11 + $0x8] sm:$0xff]  ;;  %vm182_vm0 = vcmask 130048  }
  0x96   :  { %250 = vmatprep.mubr.f32.mxu0 %v2921_v0  ;;  %321 = vmatprep.mubr.f32.mxu1 %v2921_v0  ;;  %v2325_v3 = vld [vmem:[#allocation11 + $0x10] sm:$0xff]  ;;  %v2327_v4 = vld [vmem:[#allocation11 + $0x18] sm:$0xff]  ;;  %v2329_v5 = vld [vmem:[#allocation11 + $0x20] sm:$0xff] }
  0x97   :  { %v2331_v6 = vld [vmem:[#allocation11 + $0x28] sm:$0xff]  ;;  %v2333_v7 = vld [vmem:[#allocation11 + $0x30] sm:$0xff]  ;;  %v2335_v8 = vld [vmem:[#allocation11 + $0x38] sm:$0xff] }
  0x98   :  { %v2337_v9 = vld [vmem:[#allocation11 + $0x40] sm:$0xff]  ;;  %v2339_v10 = vld [vmem:[#allocation11 + $0x48] sm:$0xff]  ;;  %v2341_v11 = vld [vmem:[#allocation11 + $0x50] sm:$0xff] }
  0x99   :  { %v2343_v12 = vld [vmem:[#allocation11 + $0x58] sm:$0xff]  ;;  %v2345_v13 = vld [vmem:[#allocation11 + $0x60] sm:$0xff]  ;;  %v2347_v14 = vld [vmem:[#allocation11 + $0x68] sm:$0xff] }
  0x9a   :  { %v2349_v15 = vld [vmem:[#allocation11 + $0x70] sm:$0xff]  ;;  %v2351_v16 = vld [vmem:[#allocation11 + $0x78] sm:$0xff]  ;;  %v2353_v17 = vld [vmem:[#allocation11 + $0x80] sm:$0xff] }
  0x9b   :  { %v2355_v18 = vld [vmem:[#allocation11 + $0x88] sm:$0xff]  ;;  %v2357_v19 = vld [vmem:[#allocation11 + $0x90] sm:$0xff]  ;;  %v2359_v20 = vld [vmem:[#allocation11 + $0x98] sm:$0xff] }
  0x9c   :  { %v2361_v21 = vld [vmem:[#allocation11 + $0xa0] sm:$0xff]  ;;  %v2363_v22 = vld [vmem:[#allocation11 + $0xa8] sm:$0xff]  ;;  %v2365_v23 = vld [vmem:[#allocation11 + $0xb0] sm:$0xff] }
  0x9d   :  { %v2367_v24 = vld [vmem:[#allocation11 + $0xb8] sm:$0xff]  ;;  %v2369_v25 = vld [vmem:[#allocation11 + $0xc0] sm:$0xff]  ;;  %v2371_v26 = vld [vmem:[#allocation11 + $0xc8] sm:$0xff] }
  0x9e   :  { %v2373_v27 = vld [vmem:[#allocation11 + $0xd0] sm:$0xff]  ;;  %v2375_v28 = vld [vmem:[#allocation11 + $0xd8] sm:$0xff]  ;;  %v2377_v29 = vld [vmem:[#allocation11 + $0xe0] sm:$0xff] }
  0x9f   :  { %v2379_v30 = vld [vmem:[#allocation11 + $0xe8] sm:$0xff]  ;;  %v2381_v31 = vld [vmem:[#allocation11 + $0xf0] sm:$0xff]  ;;  %v2383_v32 = vld [vmem:[#allocation11 + $0xf8] sm:$0xff] }
  0xa0   :  { %v2385_v33 = vld [vmem:[#allocation11 + $0x100] sm:$0xff]  ;;  %v2387_v34 = vld [vmem:[#allocation11 + $0x108] sm:$0xff]  ;;  %v2389_v35 = vld [vmem:[#allocation11 + $0x110] sm:$0xff] }
  0xa1   :  { %2937 = vst [vmem:[#allocation28_spill] sm:$0xff] %v2385_v33  ;;  %2938 = vst [vmem:[#allocation29_spill] sm:$0xff] %v2389_v35  ;;  %v2391_v36 = vld [vmem:[#allocation11 + $0x118] sm:$0xff]  ;;  %v2393_v37 = vld [vmem:[#allocation11 + $0x120] sm:$0xff] }
  0xa2   :  { %2939 = vst [vmem:[#allocation30_spill] sm:$0xff] %v2391_v36  ;;  %2940 = vst [vmem:[#allocation31_spill] sm:$0xff] %v2393_v37  ;;  %v2395_v38 = vld [vmem:[#allocation11 + $0x128] sm:$0xff]  ;;  %v2397_v39 = vld [vmem:[#allocation11 + $0x130] sm:$0xff] }
  0xa3   :  { %2941 = vst [vmem:[#allocation32_spill] sm:$0xff] %v2397_v39  ;;  %v2399_v40 = vld [vmem:[#allocation11 + $0x138] sm:$0xff]  ;;  %v2401_v41 = vld [vmem:[#allocation11 + $0x140] sm:$0xff]  ;;  %v2403_v42 = vld [vmem:[#allocation11 + $0x148] sm:$0xff] }
  0xa4   :  { %2942 = vst [vmem:[#allocation33_spill] sm:$0xff] %v2399_v40  ;;  %2943 = vst [vmem:[#allocation34_spill] sm:$0xff] %v2401_v41  ;;  %v2405_v43 = vld [vmem:[#allocation11 + $0x150] sm:$0xff]  ;;  %v2407_v44 = vld [vmem:[#allocation11 + $0x158] sm:$0xff] }
  0xa5   :  { %2944 = vst [vmem:[#allocation35_spill] sm:$0xff] %v2403_v42  ;;  %2945 = vst [vmem:[#allocation36_spill] sm:$0xff] %v2405_v43  ;;  %v2409_v45 = vld [vmem:[#allocation11 + $0x160] sm:$0xff]  ;;  %v2411_v46 = vld [vmem:[#allocation11 + $0x168] sm:$0xff] }
  0xa6   :  { %2946 = vst [vmem:[#allocation37_spill] sm:$0xff] %v2407_v44  ;;  %2947 = vst [vmem:[#allocation38_spill] sm:$0xff] %v2409_v45  ;;  %v2413_v47 = vld [vmem:[#allocation11 + $0x170] sm:$0xff]  ;;  %v2415_v48 = vld [vmem:[#allocation11 + $0x178] sm:$0xff] }
  0xa7   :  { %2948 = vst [vmem:[#allocation39_spill] sm:$0xff] %v2411_v46  ;;  %2949 = vst [vmem:[#allocation40_spill] sm:$0xff] %v2413_v47  ;;  %v2417_v49 = vld [vmem:[#allocation11 + $0x180] sm:$0xff]  ;;  %v2419_v50 = vld [vmem:[#allocation11 + $0x188] sm:$0xff] }
  0xa8   :  { %2950 = vst [vmem:[#allocation41_spill] sm:$0xff] %v2415_v48  ;;  %2951 = vst [vmem:[#allocation42_spill] sm:$0xff] %v2417_v49  ;;  %v2421_v51 = vld [vmem:[#allocation11 + $0x190] sm:$0xff]  ;;  %v2423_v52 = vld [vmem:[#allocation11 + $0x198] sm:$0xff] }
  0xa9   :  { %2952 = vst [vmem:[#allocation43_spill] sm:$0xff] %v2419_v50  ;;  %2953 = vst [vmem:[#allocation44_spill] sm:$0xff] %v2421_v51  ;;  %v2425_v53 = vld [vmem:[#allocation11 + $0x1a0] sm:$0xff]  ;;  %v2427_v54 = vld [vmem:[#allocation11 + $0x1a8] sm:$0xff] }
  0xaa   :  { %2954 = vst [vmem:[#allocation45_spill] sm:$0xff] %v2423_v52  ;;  %2955 = vst [vmem:[#allocation46_spill] sm:$0xff] %v2425_v53  ;;  %v2429_v55 = vld [vmem:[#allocation11 + $0x1b0] sm:$0xff]  ;;  %v2431_v56 = vld [vmem:[#allocation11 + $0x1b8] sm:$0xff] }
  0xab   :  { %2956 = vst [vmem:[#allocation47_spill] sm:$0xff] %v2427_v54  ;;  %2957 = vst [vmem:[#allocation48_spill] sm:$0xff] %v2429_v55  ;;  %v2433_v57 = vld [vmem:[#allocation11 + $0x1c0] sm:$0xff]  ;;  %v2435_v58 = vld [vmem:[#allocation11 + $0x1c8] sm:$0xff] }
  0xac   :  { %2958 = vst [vmem:[#allocation49_spill] sm:$0xff] %v2431_v56  ;;  %2959 = vst [vmem:[#allocation50_spill] sm:$0xff] %v2433_v57  ;;  %v2437_v59 = vld [vmem:[#allocation11 + $0x1d0] sm:$0xff]  ;;  %v2439_v60 = vld [vmem:[#allocation11 + $0x1d8] sm:$0xff] }
  0xad   :  { %2960 = vst [vmem:[#allocation51_spill] sm:$0xff] %v2435_v58  ;;  %2961 = vst [vmem:[#allocation52_spill] sm:$0xff] %v2437_v59  ;;  %v2441_v61 = vld [vmem:[#allocation11 + $0x1e0] sm:$0xff]  ;;  %v2443_v62 = vld [vmem:[#allocation11 + $0x1e8] sm:$0xff] }
  0xae   :  { %2962 = vst [vmem:[#allocation53_spill] sm:$0xff] %v2439_v60  ;;  %2963 = vst [vmem:[#allocation54_spill] sm:$0xff] %v2441_v61  ;;  %v2445_v63 = vld [vmem:[#allocation11 + $0x1f0] sm:$0xff]  ;;  %v2447_v0 = vld [vmem:[#allocation11 + $0x1f8] sm:$0xff] }
  0xaf   :  { %2964 = vst [vmem:[#allocation55_spill] sm:$0xff] %v2443_v62  ;;  %2965 = vst [vmem:[#allocation56_spill] sm:$0xff] %v2445_v63  ;;  %v2449_v51 = vld [vmem:[#allocation14] sm:$0xff]  ;;  %v2451_v55 = vld [vmem:[#allocation14 + $0x8] sm:$0xff] }
  0xb0   :  { %2966 = vst [vmem:[#allocation57_spill] sm:$0xff] %v2447_v0  ;;  %2967 = vst [vmem:[#allocation58_spill] sm:$0xff] %v2449_v51  ;;  %v2453_v53 = vld [vmem:[#allocation14 + $0x10] sm:$0xff]  ;;  %v2455_v57 = vld [vmem:[#allocation14 + $0x18] sm:$0xff] }
  0xb1   :  { %2968 = vst [vmem:[#allocation59_spill] sm:$0xff] %v2451_v55  ;;  %2969 = vst [vmem:[#allocation60_spill] sm:$0xff] %v2453_v53  ;;  %v2457_v58 = vld [vmem:[#allocation14 + $0x20] sm:$0xff]  ;;  %v2459_v59 = vld [vmem:[#allocation14 + $0x28] sm:$0xff] }
  0xb2   :  { %2970 = vst [vmem:[#allocation61_spill] sm:$0xff] %v2455_v57  ;;  %2971 = vst [vmem:[#allocation62_spill] sm:$0xff] %v2457_v58  ;;  %v2461_v60 = vld [vmem:[#allocation14 + $0x30] sm:$0xff]  ;;  %v2463_v61 = vld [vmem:[#allocation14 + $0x38] sm:$0xff] }
  0xb3   :  { %2972 = vst [vmem:[#allocation63_spill] sm:$0xff] %v2459_v59  ;;  %2973 = vst [vmem:[#allocation64_spill] sm:$0xff] %v2461_v60  ;;  %v2465_v62 = vld [vmem:[#allocation14 + $0x40] sm:$0xff]  ;;  %v2467_v63 = vld [vmem:[#allocation14 + $0x48] sm:$0xff] }
  0xb4   :  { %2974 = vst [vmem:[#allocation65_spill] sm:$0xff] %v2463_v61  ;;  %2975 = vst [vmem:[#allocation66_spill] sm:$0xff] %v2465_v62  ;;  %v2469_v0 = vld [vmem:[#allocation14 + $0x50] sm:$0xff]  ;;  %v2471_v51 = vld [vmem:[#allocation14 + $0x58] sm:$0xff] }
  0xb5   :  { %2976 = vst [vmem:[#allocation67_spill] sm:$0xff] %v2467_v63  ;;  %2977 = vst [vmem:[#allocation68_spill] sm:$0xff] %v2469_v0  ;;  %v2473_v55 = vld [vmem:[#allocation14 + $0x60] sm:$0xff]  ;;  %v2475_v53 = vld [vmem:[#allocation14 + $0x68] sm:$0xff] }
  0xb6   :  { %2978 = vst [vmem:[#allocation69_spill] sm:$0xff] %v2471_v51  ;;  %2979 = vst [vmem:[#allocation70_spill] sm:$0xff] %v2473_v55  ;;  %v2477_v57 = vld [vmem:[#allocation14 + $0x70] sm:$0xff]  ;;  %v2479_v58 = vld [vmem:[#allocation14 + $0x78] sm:$0xff] }
  0xb7   :  { %2980 = vst [vmem:[#allocation71_spill] sm:$0xff] %v2475_v53  ;;  %2981 = vst [vmem:[#allocation72_spill] sm:$0xff] %v2477_v57  ;;  %v2481_v59 = vld [vmem:[#allocation14 + $0x80] sm:$0xff]  ;;  %v2483_v60 = vld [vmem:[#allocation14 + $0x88] sm:$0xff] }
  0xb8   :  { %2982 = vst [vmem:[#allocation73_spill] sm:$0xff] %v2479_v58  ;;  %2983 = vst [vmem:[#allocation74_spill] sm:$0xff] %v2481_v59  ;;  %v2485_v61 = vld [vmem:[#allocation14 + $0x90] sm:$0xff]  ;;  %v2487_v62 = vld [vmem:[#allocation14 + $0x98] sm:$0xff] }
  0xb9   :  { %2984 = vst [vmem:[#allocation75_spill] sm:$0xff] %v2483_v60  ;;  %2985 = vst [vmem:[#allocation76_spill] sm:$0xff] %v2485_v61  ;;  %v2489_v63 = vld [vmem:[#allocation14 + $0xa0] sm:$0xff]  ;;  %v2491_v0 = vld [vmem:[#allocation14 + $0xa8] sm:$0xff] }
  0xba   :  { %2986 = vst [vmem:[#allocation77_spill] sm:$0xff] %v2487_v62  ;;  %2987 = vst [vmem:[#allocation78_spill] sm:$0xff] %v2489_v63  ;;  %v2493_v51 = vld [vmem:[#allocation14 + $0xb0] sm:$0xff]  ;;  %v2495_v55 = vld [vmem:[#allocation14 + $0xb8] sm:$0xff] }
  0xbb   :  { %2988 = vst [vmem:[#allocation79_spill] sm:$0xff] %v2491_v0  ;;  %2989 = vst [vmem:[#allocation80_spill] sm:$0xff] %v2493_v51  ;;  %v2497_v53 = vld [vmem:[#allocation14 + $0xc0] sm:$0xff]  ;;  %v2499_v57 = vld [vmem:[#allocation14 + $0xc8] sm:$0xff] }
  0xbc   :  { %2990 = vst [vmem:[#allocation81_spill] sm:$0xff] %v2495_v55  ;;  %2991 = vst [vmem:[#allocation82_spill] sm:$0xff] %v2497_v53  ;;  %v2501_v58 = vld [vmem:[#allocation14 + $0xd0] sm:$0xff]  ;;  %v2503_v59 = vld [vmem:[#allocation14 + $0xd8] sm:$0xff] }
  0xbd   :  { %2992 = vst [vmem:[#allocation83_spill] sm:$0xff] %v2499_v57  ;;  %2993 = vst [vmem:[#allocation84_spill] sm:$0xff] %v2501_v58  ;;  %v2505_v60 = vld [vmem:[#allocation14 + $0xe0] sm:$0xff]  ;;  %v2507_v61 = vld [vmem:[#allocation14 + $0xe8] sm:$0xff] }
  0xbe   :  { %2994 = vst [vmem:[#allocation85_spill] sm:$0xff] %v2503_v59  ;;  %2995 = vst [vmem:[#allocation86_spill] sm:$0xff] %v2505_v60  ;;  %v2509_v62 = vld [vmem:[#allocation14 + $0xf0] sm:$0xff]  ;;  %v2511_v63 = vld [vmem:[#allocation14 + $0xf8] sm:$0xff] }
  0xbf   :  { %2996 = vst [vmem:[#allocation87_spill] sm:$0xff] %v2507_v61  ;;  %2997 = vst [vmem:[#allocation88_spill] sm:$0xff] %v2509_v62  ;;  %v2513_v0 = vld [vmem:[#allocation14 + $0x100] sm:$0xff]  ;;  %v2515_v51 = vld [vmem:[#allocation14 + $0x108] sm:$0xff] }
  0xc0   :  { %2998 = vst [vmem:[#allocation89_spill] sm:$0xff] %v2511_v63  ;;  %2999 = vst [vmem:[#allocation90_spill] sm:$0xff] %v2513_v0  ;;  %v2517_v55 = vld [vmem:[#allocation14 + $0x110] sm:$0xff]  ;;  %v2519_v53 = vld [vmem:[#allocation14 + $0x118] sm:$0xff] }
  0xc1   :  { %3000 = vst [vmem:[#allocation91_spill] sm:$0xff] %v2515_v51  ;;  %3001 = vst [vmem:[#allocation92_spill] sm:$0xff] %v2517_v55  ;;  %v2521_v57 = vld [vmem:[#allocation14 + $0x120] sm:$0xff]  ;;  %v2523_v58 = vld [vmem:[#allocation14 + $0x128] sm:$0xff] }
  0xc2   :  { %3002 = vst [vmem:[#allocation93_spill] sm:$0xff] %v2519_v53  ;;  %3003 = vst [vmem:[#allocation94_spill] sm:$0xff] %v2521_v57  ;;  %v2525_v59 = vld [vmem:[#allocation14 + $0x130] sm:$0xff]  ;;  %v2527_v60 = vld [vmem:[#allocation14 + $0x138] sm:$0xff] }
  0xc3   :  { %3004 = vst [vmem:[#allocation95_spill] sm:$0xff] %v2523_v58  ;;  %3005 = vst [vmem:[#allocation96_spill] sm:$0xff] %v2525_v59  ;;  %v2529_v61 = vld [vmem:[#allocation14 + $0x140] sm:$0xff]  ;;  %v2531_v62 = vld [vmem:[#allocation14 + $0x148] sm:$0xff] }
  0xc4   :  { %3006 = vst [vmem:[#allocation97_spill] sm:$0xff] %v2527_v60  ;;  %3007 = vst [vmem:[#allocation98_spill] sm:$0xff] %v2529_v61  ;;  %v2533_v63 = vld [vmem:[#allocation14 + $0x150] sm:$0xff]  ;;  %v2535_v0 = vld [vmem:[#allocation14 + $0x158] sm:$0xff] }
  0xc5   :  { %3008 = vst [vmem:[#allocation99_spill] sm:$0xff] %v2531_v62  ;;  %3009 = vst [vmem:[#allocation100_spill] sm:$0xff] %v2533_v63  ;;  %v2537_v51 = vld [vmem:[#allocation14 + $0x160] sm:$0xff]  ;;  %v2539_v55 = vld [vmem:[#allocation14 + $0x168] sm:$0xff] }
  0xc6   :  { %3010 = vst [vmem:[#allocation101_spill] sm:$0xff] %v2535_v0  ;;  %3011 = vst [vmem:[#allocation102_spill] sm:$0xff] %v2537_v51  ;;  %v2541_v53 = vld [vmem:[#allocation14 + $0x170] sm:$0xff]  ;;  %v2543_v57 = vld [vmem:[#allocation14 + $0x178] sm:$0xff] }
  0xc7   :  { %3012 = vst [vmem:[#allocation103_spill] sm:$0xff] %v2539_v55  ;;  %3013 = vst [vmem:[#allocation104_spill] sm:$0xff] %v2541_v53  ;;  %v2545_v58 = vld [vmem:[#allocation14 + $0x180] sm:$0xff]  ;;  %v2547_v59 = vld [vmem:[#allocation14 + $0x188] sm:$0xff] }
  0xc8   :  { %3014 = vst [vmem:[#allocation105_spill] sm:$0xff] %v2543_v57  ;;  %3015 = vst [vmem:[#allocation106_spill] sm:$0xff] %v2545_v58  ;;  %v2549_v60 = vld [vmem:[#allocation14 + $0x190] sm:$0xff]  ;;  %v2551_v61 = vld [vmem:[#allocation14 + $0x198] sm:$0xff] }
  0xc9   :  { %3016 = vst [vmem:[#allocation107_spill] sm:$0xff] %v2547_v59  ;;  %3017 = vst [vmem:[#allocation108_spill] sm:$0xff] %v2549_v60  ;;  %v2553_v62 = vld [vmem:[#allocation14 + $0x1a0] sm:$0xff]  ;;  %v2555_v63 = vld [vmem:[#allocation14 + $0x1a8] sm:$0xff] }
  0xca   :  { %3018 = vst [vmem:[#allocation109_spill] sm:$0xff] %v2551_v61  ;;  %3019 = vst [vmem:[#allocation110_spill] sm:$0xff] %v2553_v62  ;;  %v2557_v0 = vld [vmem:[#allocation14 + $0x1b0] sm:$0xff]  ;;  %v2559_v51 = vld [vmem:[#allocation14 + $0x1b8] sm:$0xff] }
  0xcb   :  { %3020 = vst [vmem:[#allocation111_spill] sm:$0xff] %v2555_v63  ;;  %3021 = vst [vmem:[#allocation112_spill] sm:$0xff] %v2557_v0  ;;  %v2561_v55 = vld [vmem:[#allocation14 + $0x1c0] sm:$0xff]  ;;  %v2563_v53 = vld [vmem:[#allocation14 + $0x1c8] sm:$0xff] }
  0xcc   :  { %3022 = vst [vmem:[#allocation113_spill] sm:$0xff] %v2559_v51  ;;  %3023 = vst [vmem:[#allocation114_spill] sm:$0xff] %v2561_v55  ;;  %v2565_v57 = vld [vmem:[#allocation14 + $0x1d0] sm:$0xff]  ;;  %v2567_v58 = vld [vmem:[#allocation14 + $0x1d8] sm:$0xff] }
  0xcd   :  { %3024 = vst [vmem:[#allocation115_spill] sm:$0xff] %v2563_v53  ;;  %3025 = vst [vmem:[#allocation116_spill] sm:$0xff] %v2565_v57  ;;  %v2569_v59 = vld [vmem:[#allocation14 + $0x1e0] sm:$0xff]  ;;  %v2571_v60 = vld [vmem:[#allocation14 + $0x1e8] sm:$0xff] }
  0xce   :  { %3026 = vst [vmem:[#allocation117_spill] sm:$0xff] %v2567_v58  ;;  %3027 = vst [vmem:[#allocation118_spill] sm:$0xff] %v2569_v59  ;;  %v2573_v61 = vld [vmem:[#allocation14 + $0x1f0] sm:$0xff]  ;;  %v2575_v62 = vld [vmem:[#allocation14 + $0x1f8] sm:$0xff] }
  0xcf   :  { %3028 = vst [vmem:[#allocation119_spill] sm:$0xff] %v2571_v60  ;;  %3029 = vst [vmem:[#allocation120_spill] sm:$0xff] %v2573_v61  ;;  %v2580_v0 = vld [vmem:[%s2902_s7] sm:$0x1]   ;;  %v155_v58 = vld [vmem:[#allocation9 + $0x18] sm:$0xff] }
  0xd0   :  { %3030 = vst [vmem:[#allocation121_spill] sm:$0xff] %v2575_v62  ;;  %v2585_v55 = vld [vmem:[%s2903_s8] sm:$0x1]   ;;  %v159_v53 = vld [vmem:[#allocation9 + $0x38] sm:$0xff]  ;;  %v152_v51 = vld [vmem:[#allocation9] sm:$0xff] }
  0xd1   :  { %v2590_v57 = vld [vmem:[%s2904_s9] sm:$0x1]   ;;  %v156_v63 = vld [vmem:[#allocation9 + $0x20] sm:$0xff]  ;;  %v1518_v49 = vpack.c.bf16 %v159_v53, %v155_v58  ;;  %v154_v52 = vld [vmem:[#allocation9 + $0x10] sm:$0xff] }
  0xd2   :  { %v2595_v61 = vld [vmem:[%s2905_s10] sm:$0x1]   ;;  %v1516_v56 = vpack.c.bf16 %v156_v63, %v152_v51  ;;  %v158_v54 = vld [vmem:[#allocation9 + $0x30] sm:$0xff]  ;;  %v151_v50 = vld [vmem:[#allocation6] sm:$0xff] }
  0xd3   :  { %v153_v59 = vld [vmem:[#allocation9 + $0x8] sm:$0xff]  ;;  %v1520_v47 = vpack.c.bf16 %v158_v54, %v154_v52  ;;  %v335_v41 = vld [vmem:[#allocation12 + $0x18] sm:$0xff]  ;;  %1519 = vmatprep.subr.bf16.mxu1 %v1518_v49  ;;  %v332_v46 = vld [vmem:[#allocation12] sm:$0xff]  ;;  %v3031_v49 = vmov 0.0  }
  0xd4   :  { %v157_v62 = vld [vmem:[#allocation9 + $0x28] sm:$0xff]  ;;  %v339_v44 = vld [vmem:[#allocation12 + $0x38] sm:$0xff]  ;;  %v334_v53 = vld [vmem:[#allocation12 + $0x10] sm:$0xff] }
  0xd5   :  { %v1514_v60 = vpack.c.bf16 %v157_v62, %v153_v59  ;;  %v333_v43 = vld [vmem:[#allocation12 + $0x8] sm:$0xff]  ;;  %v336_v59 = vld [vmem:[#allocation12 + $0x20] sm:$0xff]  ;;  %1521 = vmatpush1.bf16.msra.mxu1 %v1520_v47  ;;  %v1526_v62 = vpack.c.bf16 %v339_v44, %v335_v41  ;;  %v338_v51 = vld [vmem:[#allocation12 + $0x30] sm:$0xff]  ;;  %v2924_v41 = vlaneseq }
  0xd6   :  { %v337_v45 = vld [vmem:[#allocation12 + $0x28] sm:$0xff]  ;;  %v1524_v42 = vpack.c.bf16 %v336_v59, %v332_v46  ;;  %v1528_v58 = vpack.c.bf16 %v338_v51, %v334_v53 }
  0xd7   :  { %1515 = vmatprep.subr.bf16.mxu0 %v1514_v60  ;;  %v1522_v48 = vpack.c.bf16 %v337_v45, %v333_v43  ;;  %1527 = vmatprep.subr.bf16.mxu1 %v1526_v62  ;;  %v2604_v43 = vshrl.u32 %v2924_v41, 7  ;;  %v340_v54 = vld [vmem:[%s2901_s6] sm:$0xf] }
  0xd8   :  { %1517 = vmatpush1.bf16.msra.mxu0 %v1516_v56  ;;  %1394 = vmatmul.mubr.msk.f32.vlgmr.msra.gmra.mrb[0].mxu1 %vm182_vm0, %v151_v50 }
  0xd9   :  { %1523 = vmatprep.subr.bf16.mxu0 %v1522_v48  ;;  %1529 = vmatpush1.bf16.msra.mxu1 %v1528_v58  ;;  %3032 = vst [vmem:[#allocation122_spill] sm:$0xff] %v2604_v43  ;;  %v2607_v44 = vsub.s32 0, %v2604_v43  ;;  %v172_v45 = vsub.s32 2, %v2604_v43  ;;  %v168_v46 = vsub.s32 1, %v2604_v43  ;;  %v176_v47 = vsub.s32 3, %v2604_v43 }
  0xda   :  { %497 = vmatprep.mubr.f32.mxu1 %v3031_v49 }
  0xdb   :  { %1393 = vmatmul.mubr.msk.f32.vlgmr.msra.gmra.mrb[0].mxu0 %vm182_vm0, %v151_v50  ;;  %3033 = vst [vmem:[#allocation123_spill] sm:$0xff] %v2607_v44  ;;  %v345_v53 = vrot.slane %v340_v54, %v2607_v44  ;;  %v353_v41 = vrot.slane %v340_v54, %v172_v45  ;;  %v349_v43 = vrot.slane %v340_v54, %v168_v46 }
  0xdc   :  { %1525 = vmatpush1.bf16.msra.mxu0 %v1524_v42  ;;  %426 = vmatprep.mubr.f32.mxu0 %v3031_v49  ;;  %v160_v42 = vld [vmem:[%s2898_s3] sm:$0xf]  ;;  %v357_v35 = vrot.slane %v340_v54, %v176_v47  ;;  %s2632_s3 = smov 0  }
  0xdd   :  { %1396 = vmatmul.mubr.msk.f32.vlgmr.msra.gmra.mrb[2].mxu1 %vm182_vm0, %v151_v50  ;;  %v165_v48 = vrot.slane %v160_v42, %v2607_v44  ;;  %v169_v52 = vrot.slane %v160_v42, %v168_v46  ;;  %v177_v56 = vrot.slane %v160_v42, %v176_v47 }
  0xdf   :  { %1395 = vmatmul.mubr.msk.f32.vlgmr.msra.gmra.mrb[2].mxu0 %vm182_vm0, %v151_v50  ;;  %v173_v50 = vrot.slane %v160_v42, %v172_v45 }
 0x1ab   :  { %v323_v59 = vpop.f32.mrb[0].mxu1 }
 0x1ac   :  { %v324_v51 = vadd.f32 %v323_v59, %v173_v50  ;;  %v325_v49 = vpop.f32.mrb[1].mxu1 }
 0x1ad   :  { %v326_v39 = vadd.f32 %v325_v49, %v177_v56 }
 0x1ae   :  { %v252_v60 = vpop.f32.mrb[0].mxu0  ;;  %330 = vst [vmem:[#allocation2 + $0x10] sm:$0xff] %v324_v51 }
 0x1af   :  { %v253_v63 = vadd.f32 %v252_v60, %v165_v48  ;;  %v254_v62 = vpop.f32.mrb[1].mxu0  ;;  %331 = vst [vmem:[#allocation2 + $0x18] sm:$0xff] %v326_v39 }
 0x1b0   :  { %v255_v58 = vadd.f32 %v254_v62, %v169_v52  ;;  %v499_v42 = vpop.f32.mrb[2].mxu1 }
 0x1b1   :  { %328 = vst [vmem:[#allocation2] sm:$0xff] %v253_v63  ;;  %v500_v48 = vadd.f32 %v499_v42, %v353_v41  ;;  %v501_v36 = vpop.f32.mrb[3].mxu1 }
 0x1b2   :  { %329 = vst [vmem:[#allocation2 + $0x8] sm:$0xff] %v255_v58  ;;  %v428_v37 = vpop.f32.mrb[2].mxu0  ;;  %v502_v44 = vadd.f32 %v501_v36, %v357_v35 }
 0x1b3   :  { %v429_v33 = vadd.f32 %v428_v37, %v345_v53  ;;  %v430_v40 = vpop.f32.mrb[3].mxu0  ;;  %506 = vst [vmem:[#allocation3 + $0x10] sm:$0xff] %v500_v48 }
 0x1b4   :  { %v431_v60 = vadd.f32 %v430_v40, %v349_v43  ;;  %507 = vst [vmem:[#allocation3 + $0x18] sm:$0xff] %v502_v44 }
 0x1b5   :  { %504 = vst [vmem:[#allocation3] sm:$0xff] %v429_v33 }
 0x1b6   :  { %505 = vst [vmem:[#allocation3 + $0x8] sm:$0xff] %v431_v60 }
 0x1b7 LB: > { %v1530_v33 = vpack.c.bf16 %v2331_v6, %v2323_v2  ;;  %v1562_v35 = vpack.c.bf16 %v2335_v8, %v2327_v4  ;;  %v1532_v36 = vpack.c.bf16 %v2329_v5, %v2321_v1  ;;  %v1564_v37 = vpack.c.bf16 %v2333_v7, %v2325_v3  ;;  %v3034_v62 = vld [vmem:[#allocation30_spill] sm:$0xff]  ;;  %v3035_v53 = vld [vmem:[#allocation33_spill] sm:$0xff]  ;;  %v3036_v58 = vld [vmem:[#allocation28_spill] sm:$0xff]  ;;  %s650_s6 = sshra.s32 %s2092_s3, 3  ;;  %s653_s26 = sand.u32 7, %s2092_s3  ;;  %s2092_s3 = sphi %s2632_s3, %s645_s3   ;;  %v2088_v0 = vphi %v2580_v0, %v861_v0   ;;  %v2084_v55 = vphi %v2585_v55, %v859_v55   ;;  %v2080_v57 = vphi %v2590_v57, %v1076_v57   ;;  %v2076_v61 = vphi %v2595_v61, %v1074_v61  }
 0x1b8   : > { %v1534_v39 = vpack.c.bf16 %v2347_v14, %v2339_v10  ;;  %v1566_v40 = vpack.c.bf16 %v2351_v16, %v2343_v12  ;;  %v1536_v41 = vpack.c.bf16 %v2345_v13, %v2337_v9  ;;  %v1568_v43 = vpack.c.bf16 %v2349_v15, %v2341_v11  ;;  %v3037_v49 = vld [vmem:[#allocation31_spill] sm:$0xff]  ;;  %v3038_v48 = vld [vmem:[#allocation29_spill] sm:$0xff]  ;;  %v3039_v60 = vld [vmem:[#allocation32_spill] sm:$0xff]  ;;  %s1408_s25 = sshll.u32 %s650_s6, 5  ;;  %s2789_s11 = ssub.s32 7, %s2092_s3 }
 0x1b9   : > { %1531 = vmatprep.subr.bf16.mxu0 %v1530_v33  ;;  %1563 = vmatprep.subr.bf16.mxu1 %v1562_v35  ;;  %v1538_v44 = vpack.c.bf16 %v2363_v22, %v2355_v18  ;;  %v1570_v45 = vpack.c.bf16 %v2367_v24, %v2359_v20  ;;  %v2114_v46 = vmov 0.0   ;;  %v1540_v47 = vpack.c.bf16 %v2361_v21, %v2353_v17  ;;  %v3040_v35 = vld [vmem:[#allocation35_spill] sm:$0xff]  ;;  %s656_s27 = sadd.s32 %s1408_s25, %s653_s26  ;;  %s865_s22 = sshra.s32 %s2789_s11, 3 }
 0x1ba   : > { %1533 = vmatpush1.bf16.msra.mxu0 %v1532_v36  ;;  %1565 = vmatpush1.bf16.msra.mxu1 %v1564_v37  ;;  %v1572_v50 = vpack.c.bf16 %v2365_v23, %v2357_v19  ;;  %v1542_v52 = vpack.c.bf16 %v2379_v30, %v2371_v26  ;;  %v1574_v54 = vpack.c.bf16 %v2383_v32, %v2375_v28  ;;  %v3041_v36 = vld [vmem:[#allocation39_spill] sm:$0xff]  ;;  %s657_s21 = scalar_lea.vmem [#allocation2], %s656_s27  ;;  %s868_s28 = sand.u32 7, %s2789_s11 }
 0x1bb   : > { %1535 = vmatprep.subr.bf16.mxu0 %v1534_v39  ;;  %1567 = vmatprep.subr.bf16.mxu1 %v1566_v40  ;;  %v1544_v56 = vpack.c.bf16 %v2377_v29, %v2369_v25  ;;  %v1576_v63 = vpack.c.bf16 %v2381_v31, %v2373_v27  ;;  %v1546_v59 = vpack.c.bf16 %v2395_v38, %v2387_v34  ;;  %v3042_v39 = vld [vmem:[#allocation37_spill] sm:$0xff]  ;;  %s1409_s16 = sshll.u32 %s865_s22, 5  ;;  %s862_s30 = scalar_lea.vmem [#allocation4], %s2092_s3 }
 0x1bc   : > { %723 = vmatprep.mubr.f32.mxu0 %v2114_v46  ;;  %794 = vmatprep.mubr.f32.mxu1 %v2114_v46  ;;  %v1578_v51 = vpack.c.bf16 %v3035_v53, %v3034_v62  ;;  %v1548_v42 = vpack.c.bf16 %v3037_v49, %v3036_v58  ;;  %v1580_v33 = vpack.c.bf16 %v3039_v60, %v3038_v48  ;;  %v3043_v40 = vld [vmem:[#allocation41_spill] sm:$0xff]  ;;  %v3053_v58 = vld [vmem:[#allocation46_spill] sm:$0xff]  ;;  %v3055_v48 = vld [vmem:[#allocation48_spill] sm:$0xff]  ;;  %s871_s23 = sadd.s32 %s1409_s16, %s868_s28  ;;  %s1077_s5 = scalar_lea.vmem [#allocation5], %s2789_s11 }
 0x1bd   : > { %v1550_v37 = vpack.c.bf16 %v3041_v36, %v3040_v35  ;;  %v3051_v62 = vld [vmem:[#allocation49_spill] sm:$0xff]  ;;  %v3057_v35 = vld [vmem:[#allocation55_spill] sm:$0xff]  ;;  %s872_s18 = scalar_lea.vmem [#allocation3], %s871_s23  ;;  %s645_s3 = sadd.s32 1, %s2092_s3  }
 0x1be   : > { %1537 = vmatpush1.bf16.msra.mxu0 %v1536_v41  ;;  %1569 = vmatpush1.bf16.msra.mxu1 %v1568_v43  ;;  %v1582_v41 = vpack.c.bf16 %v3043_v40, %v3042_v39  ;;  %v3044_v43 = vld [vmem:[#allocation34_spill] sm:$0xff]  ;;  %v3059_v39 = vld [vmem:[#allocation57_spill] sm:$0xff]  ;;  %p642_p0 = scmp.ge.s32.totalorder %s645_s3, 8  }
 0x1bf   : > { %1539 = vmatprep.subr.bf16.mxu0 %v1538_v44  ;;  %1571 = vmatprep.subr.bf16.mxu1 %v1570_v45  ;;  %v3045_v44 = vld [vmem:[#allocation38_spill] sm:$0xff]  ;;  %vm2117_vm1 = vmmov (%p642_p0), 0   ;;  %v1103_v9 = vld [vmem:[#allocation17 + $0x30] sm:$0xff] (%p642_p0)  ;;  %v1104_v10 = vld [vmem:[#allocation17 + $0x38] sm:$0xff] (%p642_p0)  ;;  %s2835_s0 = smov (%p642_p0), 0  }
 0x1c0   : > { %v1552_v45 = vpack.c.bf16 %v3045_v44, %v3044_v43  ;;  %v3061_v43 = vld [vmem:[#allocation54_spill] sm:$0xff]  ;;  %v1086_v11 = vld [vmem:[#allocation15 + $0x30] sm:$0xff] (%p642_p0)  ;;  %v1087_v12 = vld [vmem:[#allocation15 + $0x38] sm:$0xff] (%p642_p0)  ;;  %v1668_v13 = vpack.c.bf16 (%p642_p0), %v1104_v10, %v1103_v9 }
 0x1c1   :  { %v1101_v3 = vld [vmem:[#allocation17 + $0x20] sm:$0xff] (%p642_p0)  ;;  %v1102_v4 = vld [vmem:[#allocation17 + $0x28] sm:$0xff] (%p642_p0)  ;;  %v1692_v14 = vpack.c.bf16 (%p642_p0), %v1087_v12, %v1086_v11  ;;  %v1107_v21 = vld [vmem:[#allocation17 + $0x50] sm:$0xff] (%p642_p0) }
 0x1c2   : > { %1541 = vmatpush1.bf16.msra.mxu0 %v1540_v47  ;;  %1573 = vmatpush1.bf16.msra.mxu1 %v1572_v50  ;;  %v3046_v47 = vld [vmem:[#allocation36_spill] sm:$0xff]  ;;  %v1084_v5 = vld [vmem:[#allocation15 + $0x20] sm:$0xff] (%p642_p0)  ;;  %v1085_v6 = vld [vmem:[#allocation15 + $0x28] sm:$0xff] (%p642_p0)  ;;  %v1665_v7 = vpack.c.bf16 (%p642_p0), %v1102_v4, %v1101_v3 }
 0x1c3   : > { %1543 = vmatprep.subr.bf16.mxu0 %v1542_v52  ;;  %1575 = vmatprep.subr.bf16.mxu1 %v1574_v54  ;;  %v3047_v50 = vld [vmem:[#allocation40_spill] sm:$0xff]  ;;  %v3048_v54 = vld [vmem:[#allocation43_spill] sm:$0xff]  ;;  %v1689_v8 = vpack.c.bf16 (%p642_p0), %v1085_v6, %v1084_v5  ;;  %v1105_v15 = vld [vmem:[#allocation17 + $0x40] sm:$0xff] (%p642_p0) }
 0x1c4   : > { %v1584_v52 = vpack.c.bf16 %v3047_v50, %v3046_v47  ;;  %v3063_v47 = vld [vmem:[#allocation56_spill] sm:$0xff]  ;;  %v1106_v16 = vld [vmem:[#allocation17 + $0x48] sm:$0xff] (%p642_p0)  ;;  %v1088_v17 = vld [vmem:[#allocation15 + $0x40] sm:$0xff] (%p642_p0) }
 0x1c5   :  { %v1089_v18 = vld [vmem:[#allocation15 + $0x48] sm:$0xff] (%p642_p0)  ;;  %v1671_v19 = vpack.c.bf16 (%p642_p0), %v1106_v16, %v1105_v15  ;;  %v1108_v22 = vld [vmem:[#allocation17 + $0x58] sm:$0xff] (%p642_p0)  ;;  %v1090_v23 = vld [vmem:[#allocation15 + $0x50] sm:$0xff] (%p642_p0) }
 0x1c6   : > { %1545 = vmatpush1.bf16.msra.mxu0 %v1544_v56  ;;  %1577 = vmatpush1.bf16.msra.mxu1 %v1576_v63  ;;  %v3049_v56 = vld [vmem:[#allocation47_spill] sm:$0xff]  ;;  %v1695_v20 = vpack.c.bf16 (%p642_p0), %v1089_v18, %v1088_v17  ;;  %v1091_v24 = vld [vmem:[#allocation15 + $0x58] sm:$0xff] (%p642_p0)  ;;  %v1674_v25 = vpack.c.bf16 (%p642_p0), %v1108_v22, %v1107_v21  ;;  %v1109_v27 = vld [vmem:[#allocation17 + $0x60] sm:$0xff] (%p642_p0) }
 0x1c7   : > { %1547 = vmatprep.subr.bf16.mxu0 %v1546_v59  ;;  %1579 = vmatprep.subr.bf16.mxu1 %v1578_v51  ;;  %v1554_v63 = vpack.c.bf16 %v3049_v56, %v3048_v54  ;;  %v3050_v59 = vld [vmem:[#allocation45_spill] sm:$0xff]  ;;  %v3052_v51 = vld [vmem:[#allocation42_spill] sm:$0xff]  ;;  %v3065_v54 = vld [vmem:[#allocation63_spill] sm:$0xff]  ;;  %v1698_v26 = vpack.c.bf16 (%p642_p0), %v1091_v24, %v1090_v23 }
 0x1c8   : > { %v1586_v53 = vpack.c.bf16 %v3051_v62, %v3050_v59  ;;  %v1556_v49 = vpack.c.bf16 %v3053_v58, %v3052_v51  ;;  %v3067_v59 = vld [vmem:[#allocation65_spill] sm:$0xff]  ;;  %v3069_v51 = vld [vmem:[#allocation62_spill] sm:$0xff]  ;;  %v1111_v34 = vld [vmem:[#allocation17 + $0x70] sm:$0xff] (%p642_p0) }
 0x1c9   :  { %v1110_v28 = vld [vmem:[#allocation17 + $0x68] sm:$0xff] (%p642_p0)  ;;  %v1092_v29 = vld [vmem:[#allocation15 + $0x60] sm:$0xff] (%p642_p0)  ;;  %v1112_v38 = vld [vmem:[#allocation17 + $0x78] sm:$0xff] (%p642_p0) }
 0x1ca   : > { %1549 = vmatpush1.bf16.msra.mxu0 %v1548_v42  ;;  %1581 = vmatpush1.bf16.msra.mxu1 %v1580_v33  ;;  %v3054_v42 = vld [vmem:[#allocation44_spill] sm:$0xff]  ;;  %v3056_v33 = vld [vmem:[#allocation51_spill] sm:$0xff]  ;;  %v1677_v31 = vpack.c.bf16 (%p642_p0), %v1110_v28, %v1109_v27 }
 0x1cb   : > { %1551 = vmatprep.subr.bf16.mxu0 %v1550_v37  ;;  %1583 = vmatprep.subr.bf16.mxu1 %v1582_v41  ;;  %v1588_v60 = vpack.c.bf16 %v3055_v48, %v3054_v42  ;;  %v1558_v36 = vpack.c.bf16 %v3057_v35, %v3056_v33  ;;  %v3058_v37 = vld [vmem:[#allocation53_spill] sm:$0xff]  ;;  %v3060_v41 = vld [vmem:[#allocation50_spill] sm:$0xff]  ;;  %v3071_v42 = vld [vmem:[#allocation64_spill] sm:$0xff] }
 0x1cc   : > { %v1590_v40 = vpack.c.bf16 %v3059_v39, %v3058_v37  ;;  %v1560_v44 = vpack.c.bf16 %v3061_v43, %v3060_v41  ;;  %v3073_v33 = vld [vmem:[#allocation71_spill] sm:$0xff]  ;;  %v3075_v37 = vld [vmem:[#allocation73_spill] sm:$0xff]  ;;  %v3077_v41 = vld [vmem:[#allocation70_spill] sm:$0xff] }
 0x1cd   :  { %v1093_v30 = vld [vmem:[#allocation15 + $0x68] sm:$0xff] (%p642_p0) }
 0x1ce   : > { %1553 = vmatpush1.bf16.msra.mxu0 %v1552_v45  ;;  %1585 = vmatpush1.bf16.msra.mxu1 %v1584_v52  ;;  %v3062_v45 = vld [vmem:[#allocation52_spill] sm:$0xff]  ;;  %v3064_v52 = vld [vmem:[#allocation59_spill] sm:$0xff]  ;;  %v1701_v32 = vpack.c.bf16 (%p642_p0), %v1093_v30, %v1092_v29 }
 0x1cf   : > { %1555 = vmatprep.subr.bf16.mxu0 %v1554_v63  ;;  %1587 = vmatprep.subr.bf16.mxu1 %v1586_v53  ;;  %v1592_v50 = vpack.c.bf16 %v3063_v47, %v3062_v45  ;;  %v1594_v56 = vpack.c.bf16 %v3065_v54, %v3064_v52  ;;  %v3066_v63 = vld [vmem:[#allocation61_spill] sm:$0xff]  ;;  %v3068_v53 = vld [vmem:[#allocation58_spill] sm:$0xff]  ;;  %v3079_v45 = vld [vmem:[#allocation72_spill] sm:$0xff] }
 0x1d0   : > { %v1626_v62 = vpack.c.bf16 %v3067_v59, %v3066_v63  ;;  %v1596_v58 = vpack.c.bf16 %v3069_v51, %v3068_v53  ;;  %v3081_v52 = vld [vmem:[#allocation79_spill] sm:$0xff]  ;;  %v3083_v63 = vld [vmem:[#allocation81_spill] sm:$0xff]  ;;  %v3086_v51 = vld [vmem:[#allocation76_spill] sm:$0xff] }
 0x1d2   : > { %1557 = vmatpush1.bf16.msra.mxu0 %v1556_v49  ;;  %1589 = vmatpush1.bf16.msra.mxu1 %v1588_v60  ;;  %v3070_v49 = vld [vmem:[#allocation60_spill] sm:$0xff]  ;;  %v3072_v60 = vld [vmem:[#allocation67_spill] sm:$0xff] }
 0x1d3   : > { %1559 = vmatprep.subr.bf16.mxu0 %v1558_v36  ;;  %1591 = vmatprep.subr.bf16.mxu1 %v1590_v40  ;;  %v1628_v48 = vpack.c.bf16 %v3071_v42, %v3070_v49  ;;  %v1598_v35 = vpack.c.bf16 %v3073_v33, %v3072_v60  ;;  %v3074_v36 = vld [vmem:[#allocation69_spill] sm:$0xff]  ;;  %v3076_v40 = vld [vmem:[#allocation66_spill] sm:$0xff]  ;;  %v3088_v42 = vld [vmem:[#allocation83_spill] sm:$0xff] }
 0x1d4   : > { %v1630_v39 = vpack.c.bf16 %v3075_v37, %v3074_v36  ;;  %v1600_v43 = vpack.c.bf16 %v3077_v41, %v3076_v40  ;;  %v3090_v33 = vld [vmem:[#allocation85_spill] sm:$0xff]  ;;  %v3092_v37 = vld [vmem:[#allocation82_spill] sm:$0xff]  ;;  %v3094_v40 = vld [vmem:[#allocation84_spill] sm:$0xff] }
 0x1d5   : > { %v3095_v41 = vld [vmem:[#allocation88_spill] sm:$0xff] }
 0x1d6   : > { %1561 = vmatpush1.bf16.msra.mxu0 %v1560_v44  ;;  %1593 = vmatpush1.bf16.msra.mxu1 %v1592_v50  ;;  %v3078_v44 = vld [vmem:[#allocation68_spill] sm:$0xff]  ;;  %v3080_v50 = vld [vmem:[#allocation75_spill] sm:$0xff] }
 0x1d7   : > { %1595 = vmatprep.subr.bf16.mxu0 %v1594_v56  ;;  %1627 = vmatprep.subr.bf16.mxu1 %v1626_v62  ;;  %v1632_v47 = vpack.c.bf16 %v3079_v45, %v3078_v44  ;;  %v1602_v54 = vpack.c.bf16 %v3081_v52, %v3080_v50  ;;  %v3082_v56 = vld [vmem:[#allocation77_spill] sm:$0xff]  ;;  %v3085_v62 = vld [vmem:[#allocation78_spill] sm:$0xff]  ;;  %v3096_v44 = vld [vmem:[#allocation91_spill] sm:$0xff] }
 0x1d8   : > { %v1634_v59 = vpack.c.bf16 %v3083_v63, %v3082_v56  ;;  %v3097_v45 = vld [vmem:[#allocation95_spill] sm:$0xff]  ;;  %v3098_v50 = vld [vmem:[#allocation93_spill] sm:$0xff]  ;;  %v3100_v56 = vld [vmem:[#allocation90_spill] sm:$0xff] }
 0x1d9   : > { %724 = vmatmul.mubr.f32.vlgmr.msra.gmra.mrb[0].mxu0 %v2088_v0  ;;  %795 = vmatmul.mubr.f32.vlgmr.msra.gmra.mrb[0].mxu1 %v2088_v0  ;;  %v3084_v0 = vld [vmem:[#allocation74_spill] sm:$0xff]  ;;  %v3099_v52 = vld [vmem:[#allocation97_spill] sm:$0xff] }
 0x1da   : > { %1597 = vmatpush1.bf16.msra.mxu0 %v1596_v58  ;;  %1629 = vmatpush1.bf16.msra.mxu1 %v1628_v48  ;;  %v1604_v53 = vpack.c.bf16 %v3085_v62, %v3084_v0  ;;  %v3087_v58 = vld [vmem:[#allocation80_spill] sm:$0xff]  ;;  %v3089_v48 = vld [vmem:[#allocation87_spill] sm:$0xff]  ;;  %v3101_v63 = vld [vmem:[#allocation94_spill] sm:$0xff] }
 0x1db   : > { %1599 = vmatprep.subr.bf16.mxu0 %v1598_v35  ;;  %1631 = vmatprep.subr.bf16.mxu1 %v1630_v39  ;;  %v1636_v49 = vpack.c.bf16 %v3087_v58, %v3086_v51  ;;  %v1606_v60 = vpack.c.bf16 %v3089_v48, %v3088_v42  ;;  %v3091_v35 = vld [vmem:[#allocation89_spill] sm:$0xff]  ;;  %v3102_v0 = vld [vmem:[#allocation92_spill] sm:$0xff]  ;;  %v3104_v51 = vld [vmem:[#allocation99_spill] sm:$0xff] }
 0x1dc   : > { %938 = vmatprep.mubr.f32.mxu0 %v2114_v46  ;;  %1009 = vmatprep.mubr.f32.mxu1 %v2114_v46  ;;  %v1638_v36 = vpack.c.bf16 %v3091_v35, %v3090_v33  ;;  %v3093_v46 = vld [vmem:[#allocation86_spill] sm:$0xff]  ;;  %v3103_v62 = vld [vmem:[#allocation96_spill] sm:$0xff]  ;;  %v3105_v58 = vld [vmem:[#allocation103_spill] sm:$0xff] }
 0x1dd   : > { %v1608_v39 = vpack.c.bf16 %v3093_v46, %v3092_v37  ;;  %v3106_v42 = vld [vmem:[#allocation101_spill] sm:$0xff]  ;;  %v3108_v33 = vld [vmem:[#allocation98_spill] sm:$0xff]  ;;  %v3110_v37 = vld [vmem:[#allocation100_spill] sm:$0xff] }
 0x1de   : > { %1601 = vmatpush1.bf16.msra.mxu0 %v1600_v43  ;;  %1633 = vmatpush1.bf16.msra.mxu1 %v1632_v47  ;;  %v1640_v43 = vpack.c.bf16 %v3095_v41, %v3094_v40  ;;  %v1610_v47 = vpack.c.bf16 %v3097_v45, %v3096_v44  ;;  %v3107_v48 = vld [vmem:[#allocation105_spill] sm:$0xff]  ;;  %v3109_v35 = vld [vmem:[#allocation102_spill] sm:$0xff]  ;;  %v3111_v46 = vld [vmem:[#allocation104_spill] sm:$0xff] }
 0x1df   : > { %1603 = vmatprep.subr.bf16.mxu0 %v1602_v54  ;;  %1635 = vmatprep.subr.bf16.mxu1 %v1634_v59  ;;  %v1642_v54 = vpack.c.bf16 %v3099_v52, %v3098_v50  ;;  %v1612_v59 = vpack.c.bf16 %v3101_v63, %v3100_v56  ;;  %v3112_v40 = vld [vmem:[#allocation107_spill] sm:$0xff]  ;;  %v3114_v44 = vld [vmem:[#allocation109_spill] sm:$0xff]  ;;  %v3116_v50 = vld [vmem:[#allocation106_spill] sm:$0xff] }
 0x1e0   : > { %v3113_v41 = vld [vmem:[#allocation111_spill] sm:$0xff]  ;;  %v3115_v45 = vld [vmem:[#allocation113_spill] sm:$0xff]  ;;  %v3117_v52 = vld [vmem:[#allocation110_spill] sm:$0xff] }
 0x1e1   : > { %v3118_v56 = vld [vmem:[#allocation108_spill] sm:$0xff] }
 0x1e2   : > { %1605 = vmatpush1.bf16.msra.mxu0 %v1604_v53  ;;  %1637 = vmatpush1.bf16.msra.mxu1 %v1636_v49  ;;  %v1644_v53 = vpack.c.bf16 %v3103_v62, %v3102_v0  ;;  %v1614_v49 = vpack.c.bf16 %v3105_v58, %v3104_v51  ;;  %v3119_v63 = vld [vmem:[#allocation112_spill] sm:$0xff]  ;;  %v3120_v0 = vld [vmem:[#allocation115_spill] sm:$0xff]  ;;  %v3122_v51 = vld [vmem:[#allocation117_spill] sm:$0xff] }
 0x1e3   : > { %1607 = vmatprep.subr.bf16.mxu0 %v1606_v60  ;;  %1639 = vmatprep.subr.bf16.mxu1 %v1638_v36  ;;  %v1646_v60 = vpack.c.bf16 %v3107_v48, %v3106_v42  ;;  %v1616_v36 = vpack.c.bf16 %v3109_v35, %v3108_v33  ;;  %v3121_v62 = vld [vmem:[#allocation119_spill] sm:$0xff]  ;;  %v3123_v58 = vld [vmem:[#allocation121_spill] sm:$0xff]  ;;  %v3124_v42 = vld [vmem:[#allocation114_spill] sm:$0xff] }
 0x1e4   : > { %v3125_v48 = vld [vmem:[#allocation118_spill] sm:$0xff]  ;;  %v3126_v33 = vld [vmem:[#allocation116_spill] sm:$0xff] }
 0x1e5   : > { %v3127_v35 = vld [vmem:[#allocation120_spill] sm:$0xff] }
 0x1e6   : > { %1609 = vmatpush1.bf16.msra.mxu0 %v1608_v39  ;;  %1641 = vmatpush1.bf16.msra.mxu1 %v1640_v43  ;;  %v1648_v39 = vpack.c.bf16 %v3111_v46, %v3110_v37  ;;  %v1618_v43 = vpack.c.bf16 %v3113_v41, %v3112_v40  ;;  %v2115_v37 = vmov 1966171168  }
 0x1e7   : > { %1611 = vmatprep.subr.bf16.mxu0 %v1610_v47  ;;  %1643 = vmatprep.subr.bf16.mxu1 %v1642_v54  ;;  %v1650_v47 = vpack.c.bf16 %v3115_v45, %v3114_v44  ;;  %v1620_v54 = vpack.c.bf16 %v3117_v52, %v3116_v50  ;;  %v808_v46 = vunpack.c.l.s4 %v2115_v37 }
 0x1ea   : > { %1613 = vmatpush1.bf16.msra.mxu0 %v1612_v59  ;;  %1645 = vmatpush1.bf16.msra.mxu1 %v1644_v53  ;;  %v1652_v59 = vpack.c.bf16 %v3119_v63, %v3118_v56  ;;  %v1622_v53 = vpack.c.bf16 %v3121_v62, %v3120_v0 }
 0x1eb   : > { %1615 = vmatprep.subr.bf16.mxu0 %v1614_v49  ;;  %1647 = vmatprep.subr.bf16.mxu1 %v1646_v60  ;;  %v1654_v49 = vpack.c.bf16 %v3123_v58, %v3122_v51  ;;  %v1624_v60 = vpack.c.bf16 %v3125_v48, %v3124_v42 }
 0x1ee   : > { %1617 = vmatpush1.bf16.msra.mxu0 %v1616_v36  ;;  %1649 = vmatpush1.bf16.msra.mxu1 %v1648_v39  ;;  %v1656_v36 = vpack.c.bf16 %v3127_v35, %v3126_v33  ;;  %v809_v39 = vunpack.c.0.s8 %v808_v46 }
 0x1ef   : > { %1619 = vmatprep.subr.bf16.mxu0 %v1618_v43  ;;  %1651 = vmatprep.subr.bf16.mxu1 %v1650_v47  ;;  %v3128_v43 = vld [vmem:[#allocation122_spill] sm:$0xff] }
 0x1f0   : > { %v812_v44 = vsub.s32 %v809_v39, %v3128_v43 }
 0x1f2   : > { %1621 = vmatpush1.bf16.msra.mxu0 %v1620_v54  ;;  %1653 = vmatpush1.bf16.msra.mxu1 %v1652_v59 }
 0x1f3   : > { %1623 = vmatprep.subr.bf16.mxu0 %v1622_v53  ;;  %1655 = vmatprep.subr.bf16.mxu1 %v1654_v49 }
 0x1f6   : > { %1625 = vmatpush1.bf16.msra.mxu0 %v1624_v60  ;;  %1657 = vmatpush1.bf16.msra.mxu1 %v1656_v36 }
 0x1f9   : > { %939 = vmatmul.mubr.f32.vlgmr.msra.gmra.mrb[2].mxu0 %v2080_v57  ;;  %1010 = vmatmul.mubr.f32.vlgmr.msra.gmra.mrb[2].mxu1 %v2080_v57  ;;  %v658_v57 = vld [vmem:[%s657_s21] ss:$8 sm:$0xf] }
 0x2ac   : > { %v725_v40 = vpop.f32.mrb[0].mxu0  ;;  %v796_v41 = vpop.f32.mrb[0].mxu1 }
 0x2ad   : > { %v727_v45 = vpop.f32.mrb[1].mxu0  ;;  %v798_v47 = vpop.f32.mrb[1].mxu1 }
 0x2ae   : > { %v805_v50 = vcombine.low %v725_v40, %v727_v45  ;;  %v806_v52 = vcombine.low %v796_v41, %v798_v47 }
 0x2b0   : > { %v813_v54 = vrot.slane %v805_v50, %v812_v44  ;;  %v820_v56 = vrot.slane %v806_v52, %v812_v44 }
 0x2b2   : > { %v821_v63 = vcombine.low %v813_v54, %v820_v56 }
 0x2b4   : > { %v828_v59 = vrot.slane %v821_v63, %v812_v44 }
 0x2b6   : > { %v830_v0 = vadd.f32 %v828_v59, %v658_v57  ;;  %v873_v57 = vld [vmem:[%s872_s18] ss:$8 sm:$0xf] }
 0x2b8   : > { %v1399_v62 = vmul.f32 -1.442695, %v830_v0  ;;  %v838_v53 = vrot.slane %v830_v0, 1  ;;  %v849_v58 = vrot.slane %v830_v0, 3  ;;  %v846_v48 = vrot.slane %v830_v0, 2 }
 0x2ba   : > { %1782 = vpow2.f32 %v1399_v62  ;;  %v1400_v51 = vmul.f32 -1.442695, %v838_v53  ;;  %v1401_v49 = vmul.f32 -1.442695, %v849_v58 }
 0x2bc   : > { %1784 = vpow2.f32 %v1400_v51 }
 0x2bd   : > { %1786 = vpow2.f32 %v1401_v49 }
 0x2c4   : > { %v1783_v42 = vpop.eup %1782 }
 0x2c5   : > { %v834_v60 = vadd.f32 1.0, %v1783_v42 }
 0x2c6   : > { %v1785_v33 = vpop.eup %1784 }
 0x2c7   : > { %1788 = vrcp.f32 %v834_v60  ;;  %v843_v35 = vadd.f32 1.0, %v1785_v33  ;;  %v1787_v43 = vpop.eup %1786 }
 0x2c8   : > { %1790 = vtanh.f32 %v846_v48  ;;  %v854_v63 = vadd.f32 1.0, %v1787_v43 }
 0x2c9   : > { %1792 = vrcp.f32 %v843_v35 }
 0x2ca   : > { %1794 = vrcp.f32 %v854_v63  ;;  %v1098_v63 = vld [vmem:[#allocation17 + $0x8] sm:$0xff] (%p642_p0) }
 0x2cc   : > { %v940_v36 = vpop.f32.mrb[2].mxu0  ;;  %v1011_v37 = vpop.f32.mrb[2].mxu1 }
 0x2cd   : > { %v942_v46 = vpop.f32.mrb[3].mxu0  ;;  %v1013_v39 = vpop.f32.mrb[3].mxu1 }
 0x2ce   : > { %v1020_v40 = vcombine.low %v940_v36, %v942_v46  ;;  %v1021_v41 = vcombine.low %v1011_v37, %v1013_v39 }
 0x2d0   : > { %v1028_v45 = vrot.slane %v1020_v40, %v812_v44  ;;  %v1035_v47 = vrot.slane %v1021_v41, %v812_v44 }
 0x2d1   : > { %v1789_v50 = vpop.eup %1788 }
 0x2d2   : > { %v1791_v52 = vpop.eup %1790  ;;  %v1036_v54 = vcombine.low %v1028_v45, %v1035_v47 }
 0x2d3   : > { %v1793_v56 = vpop.eup %1792  ;;  %v858_v0 = vmul.f32 %v1791_v52, %v1789_v50 }
 0x2d4   : > { %v857_v59 = vmul.f32 %v2084_v55, %v1793_v56  ;;  %v1043_v62 = vrot.slane %v1036_v54, %v812_v44  ;;  %v1795_v48 = vpop.eup %1794  ;;  %v1097_v56 = vld [vmem:[#allocation17] sm:$0xff] (%p642_p0) }
 0x2d6   : > { %v859_v55 = vadd.f32 %v858_v0, %v857_v59   ;;  %v1045_v53 = vadd.f32 %v1043_v62, %v873_v57  ;;  %v1080_v59 = vld [vmem:[#allocation15] sm:$0xff] (%p642_p0)  ;;  %v2116_v62 = vmov (%p642_p0), 0.0|0.0  }
 0x2d7   :  { %1658 = vmatprep.subr.bf16.mxu0 (%p642_p0), %v2116_v62  ;;  %1682 = vmatprep.subr.bf16.mxu1 (%p642_p0), %v2116_v62 }
 0x2d8   : > { %1796 = vtanh.f32 %v859_v55  ;;  %v1404_v51 = vmul.f32 -1.442695, %v1045_v53  ;;  %v1053_v58 = vrot.slane %v1045_v53, 1  ;;  %v1064_v42 = vrot.slane %v1045_v53, 3  ;;  %v1094_v55 = vld [vmem:[#allocation15 + $0x70] sm:$0xff] (%p642_p0) }
 0x2d9   : > { %v1061_v36 = vrot.slane %v1045_v53, 2  ;;  %v1659_v53 = vpack.c.bf16 (%p642_p0), %v1098_v63, %v1097_v56 }
 0x2da   : > { %1798 = vpow2.f32 %v1404_v51  ;;  %v1405_v49 = vmul.f32 -1.442695, %v1053_v58  ;;  %v1406_v33 = vmul.f32 -1.442695, %v1064_v42  ;;  %v1081_v51 = vld [vmem:[#allocation15 + $0x8] sm:$0xff] (%p642_p0)  ;;  %v1099_v58 = vld [vmem:[#allocation17 + $0x10] sm:$0xff] (%p642_p0) }
 0x2db   :  { %v1683_v42 = vpack.c.bf16 (%p642_p0), %v1081_v51, %v1080_v59  ;;  %1660 = vmatpush3.bf16.msra.mxu0 (%p642_p0), %v1659_v53 }
 0x2dc   : > { %1800 = vpow2.f32 %v1405_v49  ;;  %v1100_v49 = vld [vmem:[#allocation17 + $0x18] sm:$0xff] (%p642_p0)  ;;  %1661 = vmatprep.subr.bf16.mxu0 (%p642_p0), %v2116_v62 }
 0x2dd   : > { %1802 = vpow2.f32 %v1406_v33  ;;  %v1662_v1 = vpack.c.bf16 (%p642_p0), %v1100_v49, %v1099_v58  ;;  %1684 = vmatpush3.bf16.msra.mxu1 (%p642_p0), %v1683_v42 }
 0x2de   :  { %1685 = vmatprep.subr.bf16.mxu1 (%p642_p0), %v2116_v62 }
 0x2df   :  { %1663 = vmatpush3.bf16.msra.mxu0 (%p642_p0), %v1662_v1 }
 0x2e0   :  { %1664 = vmatprep.subr.bf16.mxu0 (%p642_p0), %v2116_v62 }
 0x2e2   : > { %v1797_v60 = vpop.eup %1796 }
 0x2e3   : > { %v861_v0 = vmul.f32 %v1797_v60, %v1795_v48   ;;  %v1082_v48 = vld [vmem:[#allocation15 + $0x10] sm:$0xff] (%p642_p0)  ;;  %v1083_v60 = vld [vmem:[#allocation15 + $0x18] sm:$0xff] (%p642_p0)  ;;  %1666 = vmatpush3.bf16.msra.mxu0 (%p642_p0), %v1665_v7 }
 0x2e4   : > { %v1799_v35 = vpop.eup %1798  ;;  %v1686_v2 = vpack.c.bf16 (%p642_p0), %v1083_v60, %v1082_v48  ;;  %1667 = vmatprep.subr.bf16.mxu0 (%p642_p0), %v2116_v62 }
 0x2e5   : > { %863 = vst [vmem:[%s862_s30] sm:$0x1] %v861_v0  ;;  %v1049_v44 = vadd.f32 1.0, %v1799_v35  ;;  %v3129_v0 = vmov (%p642_p0), 0.0  }
 0x2e6   : > { %v1801_v37 = vpop.eup %1800  ;;  %1476 = vmatprep.mubr.msk.f32.mxu0 (%p642_p0), %vm2117_vm1, %v3129_v0  ;;  %1511 = vmatprep.mubr.msk.f32.mxu1 (%p642_p0), %vm2117_vm1, %v3129_v0 }
 0x2e7   : > { %1804 = vrcp.f32 %v1049_v44  ;;  %v1058_v46 = vadd.f32 1.0, %v1801_v37  ;;  %v1803_v39 = vpop.eup %1802  ;;  %1687 = vmatpush3.bf16.msra.mxu1 (%p642_p0), %v1686_v2  ;;  %1669 = vmatpush3.bf16.msra.mxu0 (%p642_p0), %v1668_v13  ;;  %v3130_v44 = vlaneseq (%p642_p0) }
 0x2e8   : > { %1806 = vtanh.f32 %v1061_v36  ;;  %v1069_v45 = vadd.f32 1.0, %v1803_v39  ;;  %1688 = vmatprep.subr.bf16.mxu1 (%p642_p0), %v2116_v62  ;;  %1670 = vmatprep.subr.bf16.mxu0 (%p642_p0), %v2116_v62  ;;  %v1267_v39 = vld [vmem:[%s2909_s14] sm:$0xff] (%p642_p0) }
 0x2e9   : > { %1808 = vrcp.f32 %v1058_v46  ;;  %v1263_v37 = vand.u32 (%p642_p0), 127, %v3130_v44  ;;  %v3131_v46 = vld [vmem:[#allocation122_spill] sm:$0xff] (%p642_p0) }
 0x2ea   : > { %1810 = vrcp.f32 %v1069_v45 }
 0x2eb   :  { %1690 = vmatpush3.bf16.msra.mxu1 (%p642_p0), %v1689_v8  ;;  %1672 = vmatpush3.bf16.msra.mxu0 (%p642_p0), %v1671_v19  ;;  %vm1268_vm2 = vcmp.eq.s32.totalorder (%p642_p0), %v1263_v37, 3  ;;  %vm1266_vm3 = vcmp.eq.s32.totalorder (%p642_p0), %v3131_v46, %v1263_v37 }
 0x2ec   :  { %1691 = vmatprep.subr.bf16.mxu1 (%p642_p0), %v2116_v62  ;;  %1673 = vmatprep.subr.bf16.mxu0 (%p642_p0), %v2116_v62  ;;  %v1079_v36 = vld [vmem:[#allocation4] sm:$0xff] (%p642_p0) }
 0x2ef   :  { %1693 = vmatpush3.bf16.msra.mxu1 (%p642_p0), %v1692_v14  ;;  %1675 = vmatpush3.bf16.msra.mxu0 (%p642_p0), %v1674_v25 }
 0x2f0   :  { %1694 = vmatprep.subr.bf16.mxu1 (%p642_p0), %v2116_v62  ;;  %1676 = vmatprep.subr.bf16.mxu0 (%p642_p0), %v2116_v62 }
 0x2f1   : > { %v1805_v40 = vpop.eup %1804 }
 0x2f2   : > { %v1807_v41 = vpop.eup %1806 }
 0x2f3   : > { %v1809_v43 = vpop.eup %1808  ;;  %v1073_v50 = vmul.f32 %v1807_v41, %v1805_v40  ;;  %1696 = vmatpush3.bf16.msra.mxu1 (%p642_p0), %v1695_v20  ;;  %1678 = vmatpush3.bf16.msra.mxu0 (%p642_p0), %v1677_v31  ;;  %v2118_v40 = vmov (%p642_p0), -10000.0  }
 0x2f4   : > { %v1072_v47 = vmul.f32 %v2076_v61, %v1809_v43  ;;  %v1811_v52 = vpop.eup %1810  ;;  %1697 = vmatprep.subr.bf16.mxu1 (%p642_p0), %v2116_v62  ;;  %1679 = vmatprep.subr.bf16.mxu0 (%p642_p0), %v2116_v62  ;;  %v1269_v41 = vsel (%p642_p0), %vm1268_vm2, 0.0, %v2118_v40  }
 0x2f5   :  { %v2094_v63 = vmov (%p642_p0), %v1269_v41  }
 0x2f6   : > { %v1074_v61 = vadd.f32 %v1073_v50, %v1072_v47   ;;  %v1407_v47 = vld [vmem:[%s2908_s13] ss:$0 sm:$0xff] (%p642_p0) }
 0x2f7   :  { %1699 = vmatpush3.bf16.msra.mxu1 (%p642_p0), %v1698_v26 }
 0x2f8   : > { %1812 = vtanh.f32 %v1074_v61  ;;  %1700 = vmatprep.subr.bf16.mxu1 (%p642_p0), %v2116_v62  ;;  %v1095_v61 = vld [vmem:[#allocation15 + $0x78] sm:$0xff] (%p642_p0) }
 0x2f9   :  { %v1704_v33 = vpack.c.bf16 (%p642_p0), %v1095_v61, %v1094_v55 }
 0x2fb   :  { %1702 = vmatpush3.bf16.msra.mxu1 (%p642_p0), %v1701_v32 }
 0x2fc   :  { %1703 = vmatprep.subr.bf16.mxu1 (%p642_p0), %v2116_v62 }
 0x2ff   :  { %644 = sbr.rel (!%p642_p0) target bundleno = 439 (0x1b7), region = 148  ;;  %1705 = vmatpush3.bf16.msra.mxu1 (%p642_p0), %v1704_v33 }
 0x302   : > { %v1813_v54 = vpop.eup %1812  ;;  %1512 = vmatmul.mubr.f32.vlgmr.msra.gmra.mrb[0].mxu1 (%p642_p0), %v1079_v36 }
 0x303   : > { %v1076_v57 = vmul.f32 %v1813_v54, %v1811_v52  }
 0x305   : > { %1078 = vst [vmem:[%s1077_s5] sm:$0x1] %v1076_v57  ;;  %v1680_v57 = vpack.c.bf16 (%p642_p0), %v1112_v38, %v1111_v34 }
 0x307   :  { %1681 = vmatpush3.bf16.msra.mxu0 %v1680_v57 }
 0x30c   :  { %v1096_v35 = vld [vmem:[#allocation5] sm:$0xff] }
 0x30d   :  { %1477 = vmatmul.mubr.f32.vlgmr.msra.gmra.mrb[0].mxu0 %v1096_v35 }
 0x3d5   :  { %v1249_v45 = vpop.f32.mrb[0].mxu1 }
 0x3d6   :  { %v1513_v54 = vpop.f32.mrb[1].mxu1 }
 0x3e0   :  { %v1179_v43 = vpop.f32.mrb[0].mxu0 }
 0x3e1   :  { %v1478_v50 = vpop.f32.mrb[1].mxu0  ;;  %v1250_v52 = vadd.f32 %v1249_v45, %v1179_v43 }
 0x3e3   :  { %v1260_v56 = vadd.f32 %v1407_v47, %v1250_v52 }
 0x3e5   :  { %1261 = vst [vmem:[#allocation18] sm:$0xff] %v1260_v56 }
 0x3e6 LB: > { %v3132_v59 = vld [vmem:[#allocation123_spill] sm:$0xff]  ;;  %v3133_v53 = vld [vmem:[#allocation122_spill] sm:$0xff]  ;;  %s1304_s13 = scalar_lea.vmem [#allocation18], %s2100_s0  ;;  %s1302_s14 = scalar_lea.vmem [#allocation19], %s2100_s0  ;;  %s2100_s0 = sphi %s2835_s0, %s1275_s0   ;;  %v2096_v63 = vphi %v2094_v63, %v2095_v63  }
 0x3e7   : > { %v1280_v62 = vrot.slane %v2096_v63, %v3132_v59  ;;  %s1275_s0 = sadd.s32 1, %s2100_s0  }
 0x3e8   : > { %p1272_p1 = scmp.ge.s32.totalorder %s1275_s0, 8  }
 0x3e9   : > { %v1281_v51 = vsel %vm1266_vm3, %v1280_v62, 0.0  ;;  %v1307_v12 = vld [vmem:[%s2910_s15] sm:$0x1] (%p1272_p1)  ;;  %vm1309_vm8 = vcmp.eq.s32.totalorder (%p1272_p1), %v1263_v37, 4  ;;  %s2119_s1 = smov (%p1272_p1), [#allocation19]   ;;  %s2120_s7 = smov (%p1272_p1), [#allocation18]  }
 0x3ea   : > { %1282 = vadd.xlane.f32.xlu0 %v1281_v51  ;;  %vm2853_vm9 = vmor (%p1272_p1), %vm1309_vm8, %vm1268_vm2  ;;  %s1329_s20 = sshll.u32 (%p1272_p1), %s2119_s1, 4  ;;  %s1319_s8 = sshll.u32 (%p1272_p1), %s2120_s7, 4  ;;  %s1330_s20 = int_to_ptr.vmem [resolvable:$true] %s1329_s20  ;;  %s1320_s8 = int_to_ptr.vmem [resolvable:$true] %s1319_s8 }
 0x3eb   :  { %s1968_s9 = scalar_lea.vmem (%p1272_p1), %s1330_s20, 128  ;;  %p1973_p3 = scmp.lt.s32.totalorder (%p1272_p1), %s1330_s20, %s1330_s20 }
 0x3ec   : > { %v1305_v2 = vld [vmem:[%s1304_s13] sm:$0x1]  ;;  %p1969_p2 = scmp.ne.s32.totalorder (%p1272_p1), %s1330_s20, %s1968_s9  ;;  %p1974_p4 = scmp.lt.s32.totalorder (%p1272_p1), %s1968_s9, %s1968_s9 }
 0x3ee   :  { %p1975_p5 = por (%p1272_p1), %p1974_p4, %p1973_p3 }
 0x3f0   :  { %p1976_p6 = pnand (%p1272_p1), %p1975_p5, %p1969_p2 }
 0x477   : > { %v1283_v58 = vpop.xlane.xlu0 %1282 }
 0x478   : > { %v1284_v49 = vadd.f32 %v1283_v58, %v1267_v39 }
 0x47a   : > { %v1285_v42 = vrot.slane %v1284_v49, 4 }
 0x47c   : > { %v1286_v48 = vmax.f32 %v1284_v49, %v1285_v42 }
 0x47e   : > { %v1287_v60 = vrot.slane %v1286_v48, 2 }
 0x480   : > { %v1288_v0 = vmax.f32 %v1286_v48, %v1287_v60 }
 0x482   : > { %v1289_v1 = vrot.slane %v1288_v0, 1 }
 0x484   : > { %v1290_v3 = vmax.f32 %v1288_v0, %v1289_v1 }
 0x486   : > { %vm1291_vm4 = vcmp.eq.f32.partialorder %v1284_v49, %v1290_v3  ;;  %v1306_v4 = vadd.f32 %v1305_v2, %v1290_v3  }
 0x487   : > { %v1292_v5 = vsel %vm1291_vm4, %v3133_v53, 8 }
 0x488   : > { %v1293_v6 = vrot.slane %v1292_v5, 4  ;;  %v2095_v63 = vmov %v1306_v4   ;;  %v1308_v13 = vadd.f32 (%p1272_p1), %v1307_v12, %v1306_v4 }
 0x48a   : > { %vm1294_vm5 = vcmp.lt.s32.totalorder %v1292_v5, %v1293_v6  ;;  %v1311_v15 = vsel (%p1272_p1), %vm2853_vm9, -10000.0, %v1308_v13 }
 0x48b   : > { %v1295_v7 = vsel %vm1294_vm5, %v1292_v5, %v1293_v6 }
 0x48c   : > { %v1296_v8 = vrot.slane %v1295_v7, 2 }
 0x48e   : > { %vm1297_vm6 = vcmp.lt.s32.totalorder %v1295_v7, %v1296_v8  ;;  %1274 = sbr.rel (!%p1272_p1) target bundleno = 998 (0x3e6), region = 159 }
 0x48f   : > { %v1298_v9 = vsel %vm1297_vm6, %v1295_v7, %v1296_v8 }
 0x490   : > { %v1299_v10 = vrot.slane %v1298_v9, 1 }
 0x492   : > { %vm1300_vm7 = vcmp.lt.s32.totalorder %v1298_v9, %v1299_v10 }
 0x493   : > { %v1301_v11 = vsel %vm1300_vm7, %v1298_v9, %v1299_v10 }
 0x494   : > { %1303 = vst [vmem:[%s1302_s14] sm:$0x1] %v1301_v11 }
 0x495   :  { %1979 = shalt.err (!%p1976_p6)
}
 0x496   :  { %s1980_s3 = scalar_lea.hbm %s2912_s17, 128 }
 0x497   :  { %p1981_p7 = scmp.ne.s32.totalorder %s2912_s17, %s1980_s3  ;;  %p1984_p8 = scmp.lt.u32.totalorder %s1980_s3, %s2912_s17 }
 0x499   :  { %p1986_p9 = pnand %p1984_p8, %p1981_p7 }
 0x49b   :  { %1989 = shalt.err (!%p1986_p9)
}
 0x49c   :  { %1332 = dma.vmem_to_hbm [thread:$0]  %s1330_s20, 128, %s2912_s17, [#allocation20]   ;;  %1312 = vst [vmem:[#allocation21] sm:$0x1] %v1311_v15 }
 0x49d   :  { %s1990_s22 = scalar_lea.vmem %s1320_s8, 128  ;;  %p1995_p11 = scmp.lt.s32.totalorder %s1320_s8, %s1320_s8 }
 0x49e   :  { %p1991_p10 = scmp.ne.s32.totalorder %s1320_s8, %s1990_s22  ;;  %p1996_p12 = scmp.lt.s32.totalorder %s1990_s22, %s1990_s22 }
 0x4a0   :  { %p1997_p13 = por %p1996_p12, %p1995_p11 }
 0x4a2   :  { %p1998_p0 = pnand %p1997_p13, %p1991_p10 }
 0x4a4   :  { %2001 = shalt.err (!%p1998_p0)
}
 0x4a5   :  { %s3136_s23 = sld [smem:[#allocation127_spill]] }
 0x4ab   :  { %s2002_s18 = scalar_lea.hbm %s3136_s23, 128 }
 0x4ac   :  { %p2003_p1 = scmp.ne.s32.totalorder %s3136_s23, %s2002_s18  ;;  %p2006_p2 = scmp.lt.u32.totalorder %s2002_s18, %s3136_s23 }
 0x4ae   :  { %p2008_p3 = pnand %p2006_p2, %p2003_p1 }
 0x4b0   :  { %2011 = shalt.err (!%p2008_p3)
}
 0x4b1   :  { %1322 = dma.vmem_to_hbm [thread:$0]  %s1320_s8, 128, %s3136_s23, [#allocation8]  }
 0x4b2   :  { %s2121_s29 = smov [#allocation21]  }
 0x4b3   :  { %s1339_s0 = sshll.u32 %s2121_s29, 4  ;;  %s1340_s0 = int_to_ptr.vmem [resolvable:$true] %s1339_s0 }
 0x4b4   :  { %s2012_s13 = scalar_lea.vmem %s1340_s0, 16  ;;  %s2016_s14 = scalar_lea.vmem %s1340_s0, 32 }
 0x4b5   :  { %p2013_p4 = scmp.ne.s32.totalorder %s1340_s0, %s2012_s13  ;;  %p2017_p5 = scmp.lt.s32.totalorder %s1340_s0, %s1340_s0 }
 0x4b6   :  { %p2018_p6 = scmp.lt.s32.totalorder %s2016_s14, %s2012_s13 }
 0x4b8   :  { %p2019_p7 = por %p2018_p6, %p2017_p5 }
 0x4ba   :  { %p2020_p8 = pnand %p2019_p7, %p2013_p4 }
 0x4bc   :  { %2023 = shalt.err (!%p2020_p8)
}
 0x4bd   :  { %s3137_s1 = sld [smem:[#allocation128_spill]] }
 0x4c3   :  { %s2024_s20 = scalar_lea.hbm %s3137_s1, 16 }
 0x4c4   :  { %p2025_p9 = scmp.ne.s32.totalorder %s3137_s1, %s2024_s20  ;;  %p2028_p10 = scmp.lt.u32.totalorder %s2024_s20, %s3137_s1 }
 0x4c6   :  { %p2030_p11 = pnand %p2028_p10, %p2025_p9 }
 0x4c8   :  { %2033 = shalt.err (!%p2030_p11)
}
 0x4c9   :  { %1342 = dma.vmem_to_hbm [thread:$0]  %s1340_s0, 16, %s3137_s1, [#allocation20]  }
 0x4ca   :  { %2070 = dma.done.wait [#allocation8], 128  }
 0x4cb   :  { %2071 = vsyncadd [#allocation8], 4294967168 }
 0x4cc   :  { %2072 = dma.done.wait [#allocation20], 144  }
 0x4cd   :  { %2073 = vsyncadd [#allocation20], 4294967152 }
 0x4ce   :  { %1352 = vsyncpa [#allocation7], 1 }
 0x4cf   :  { %1353 = vsyncpa [#allocation10], 1 }
 0x4d0   :  { %1354 = vsyncpa [#allocation13], 1 }
 0x4d1   :  { %1355 = vsyncpa [#allocation16], 1 }
 0x4d2   :  { %1356 = vsyncpa [#allocation8], 1 }
 0x4d3   :  { %1357 = vsyncpa [#allocation20], 1 }

</bundles_post_ra>
